<compile_context>
chip_gen: v6e
topology: v6e:2x2x1
jax: 0.10.0
libtpu: 0.0.40
codegen_flags: <defaults>
</compile_context>

<pallas_src>
import math
import functools

import jax
import jax.numpy as jnp
from jax import lax
from jax.experimental import pallas as pl
from jax.experimental.pallas import tpu as pltpu


def _skew(qer, col, row, *, impl):
    """Srel[i, j] = QEr[i, S-1-i+j]; entries with j > i are don't-care (masked)."""
    S = qer.shape[0]
    if impl == "gather":
        # One O(S^2) lane gather; indices clipped so padding lanes stay in range.
        idx = jnp.clip(col - row + (S - 1), 0, S - 1)
        return jnp.take_along_axis(qer, idx, axis=1, mode="promise_in_bounds")
    if impl == "reshape":
        # The classic pad + reshape skew trick, done once in VMEM.
        padded = jnp.pad(qer, ((0, 0), (1, 0)))              # (S, S+1)
        return padded.reshape(S + 1, S)[1:, :]               # (S, S)
    # "select": portable fallback (unrolled masked adds); only used when the
    # O(S^2) layout ops above fail to lower for this configuration.
    delta = col - row
    srel = jnp.zeros((S, S), jnp.float32)
    for c in range(S):
        srel = srel + jnp.where(delta == (c - (S - 1)), qer[:, c:c + 1], 0.0)
    return srel


def _rga_kernel(x_ref, wqkv_ref, bqkv_ref, ert_ref, o_ref, *,
                num_heads, precise, skew_impl):
    """One grid step = one batch element, all heads."""
    S = x_ref.shape[1]
    D = x_ref.shape[2]
    dh = D // num_heads
    cdt = jnp.float32 if precise else jnp.bfloat16

    # Fused QKV projection: a single MXU pass over x.  The 1/sqrt(dh) scale is
    # pre-folded into the Q columns of wqkv/bqkv by the wrapper.
    x2 = x_ref[0].astype(cdt)                                               # (S, D)
    qkv = jnp.dot(x2, wqkv_ref[...], preferred_element_type=jnp.float32)
    qkv = qkv + bqkv_ref[...]                                               # (S, 3D) f32

    # Hoisted index / mask material (built once, reused by every head).
    row = lax.broadcasted_iota(jnp.int32, (S, S), 0)
    col = lax.broadcasted_iota(jnp.int32, (S, S), 1)
    causal = col <= row
    ert = ert_ref[...]                                                      # (dh, S)

    for h in range(num_heads):                     # static unroll; heads are few
        lo = h * dh
        qh = qkv[:, lo:lo + dh].astype(cdt)                                 # (S, dh)
        khT = qkv[:, D + lo:D + lo + dh].T.astype(cdt)                      # (dh, S)
        vh = qkv[:, 2 * D + lo:2 * D + lo + dh].astype(cdt)                 # (S, dh)

        qer = jnp.dot(qh, ert, preferred_element_type=jnp.float32)          # (S, S)
        srel = _skew(qer, col, row, impl=skew_impl)                         # (S, S)
        qk = jnp.dot(qh, khT, preferred_element_type=jnp.float32)           # (S, S)

        scores = jnp.where(causal, qk + srel, -jnp.inf)   # already scaled via Q
        m = jnp.max(scores, axis=-1, keepdims=True)
        e = jnp.exp(scores - m)
        l = jnp.sum(e, axis=-1, keepdims=True)
        if precise:
            p = e / l
        else:
            p = e * pl.reciprocal(l, approx=True)          # EUP slot, VPU stays free

        out_h = jnp.dot(p.astype(cdt), vh, preferred_element_type=jnp.float32)
        # In-place per-head write: no concatenate, no extra liveness.
        o_ref[0, :, lo:lo + dh] = out_h.astype(o_ref.dtype)
    # nn.Dropout(0.1) is identity in eval mode.


def _build_call(B, S, D, dh, out_dtype, *, num_heads, precise, skew_impl):
    kernel = functools.partial(_rga_kernel, num_heads=num_heads,
                               precise=precise, skew_impl=skew_impl)
    return pl.pallas_call(
        kernel,
        out_shape=jax.ShapeDtypeStruct((B, S, D), out_dtype),
        grid=(B,),
        in_specs=[
            pl.BlockSpec((1, S, D), lambda b: (b, 0, 0)),    # x (one batch row)
            pl.BlockSpec((D, 3 * D), lambda b: (0, 0)),      # [Wq^T*s | Wk^T | Wv^T]
            pl.BlockSpec((1, 3 * D), lambda b: (0, 0)),      # [bq*s  | bk   | bv  ]
            pl.BlockSpec((dh, S), lambda b: (0, 0)),         # Er[start:].T
        ],
        out_specs=pl.BlockSpec((1, S, D), lambda b: (b, 0, 0)),
        compiler_params=pltpu.CompilerParams(dimension_semantics=("parallel",)),
    )


def relative_global_attention(x, wq, bq, wk, bk, wv, bv, er, *,
                              num_heads, max_len, precise=False, skew_impl=None):
    B, S, D = x.shape
    assert D % num_heads == 0 and S <= max_len
    dh = D // num_heads
    scale = 1.0 / math.sqrt(dh)
    cdt = jnp.float32 if precise else jnp.bfloat16

    # Fused QKV weight/bias in y = x @ W^T + b layout; 1/sqrt(dh) folded into Q.
    wqkv = jnp.concatenate([wq.T * scale, wk.T, wv.T], axis=1).astype(cdt)   # (D, 3D)
    bqkv = jnp.concatenate([bq * scale, bk, bv]).reshape(1, 3 * D).astype(jnp.float32)
    start = max_len - S
    ert = er[start:, :].T.astype(cdt)                                        # (dh, S)

    impls = (skew_impl,) if skew_impl is not None else ("gather", "reshape", "select")
    err = None
    for impl in impls:
        try:
            call = _build_call(B, S, D, dh, x.dtype, num_heads=num_heads,
                               precise=precise, skew_impl=impl)
            return jax.block_until_ready(call(x, wqkv, bqkv, ert))
        except Exception as e:   # skew layout op unavailable -> try next impl
            err = e
    raise err


def _reference(x, wq, bq, wk, bk, wv, bv, er, *, num_heads, max_len):
    """Pure-JAX transcription of the PyTorch forward (eval mode), for checking."""
    B, S, D = x.shape
    dh = D // num_heads
    k_t = (x @ wk.T + bk).reshape(B, S, num_heads, dh).transpose(0, 2, 3, 1)
    v = (x @ wv.T + bv).reshape(B, S, num_heads, dh).transpose(0, 2, 1, 3)
    q = (x @ wq.T + bq).reshape(B, S, num_heads, dh).transpose(0, 2, 1, 3)
    start = max_len - S
    er_t = er[start:, :].T
    qer = q @ er_t
    padded = jnp.pad(qer, ((0, 0), (0, 0), (0, 0), (1, 0)))
    srel = padded.reshape(B, num_heads, S + 1, S)[:, :, 1:, :]
    qk_t = q @ k_t
    attn = (qk_t + srel) / math.sqrt(dh)
    mask = jnp.tril(jnp.ones((S, S)))
    attn = jnp.where(mask == 0, -jnp.inf, attn)
    attn = jax.nn.softmax(attn, axis=-1)
    out = attn @ v
    return out.transpose(0, 2, 1, 3).reshape(B, S, D)


if __name__ == "__main__":
    B, S, D, H, MAX_LEN = 2, 8, 32, 4, 64

    key = jax.random.PRNGKey(0)
    ks = jax.random.split(key, 8)
    x = jax.random.normal(ks[0], (B, S, D), jnp.float32)
    wq = jax.random.normal(ks[1], (D, D), jnp.float32) * 0.1
    bq = jax.random.normal(ks[2], (D,), jnp.float32) * 0.1
    wk = jax.random.normal(ks[3], (D, D), jnp.float32) * 0.1
    bk = jax.random.normal(ks[4], (D,), jnp.float32) * 0.1
    wv = jax.random.normal(ks[5], (D, D), jnp.float32) * 0.1
    bv = jax.random.normal(ks[6], (D,), jnp.float32) * 0.1
    er = jax.random.normal(ks[7], (MAX_LEN, D // H), jnp.float32)   # self.Er

    ref = _reference(x, wq, bq, wk, bk, wv, bv, er, num_heads=H, max_len=MAX_LEN)

    # Precise path (f32 MXU, exact softmax normalization): tight check.
    out_p = relative_global_attention(x, wq, bq, wk, bk, wv, bv, er,
                                      num_heads=H, max_len=MAX_LEN, precise=True)
    out_p = jax.block_until_ready(out_p)
    assert out_p.shape == (B, S, D)
    err_p = float(jnp.max(jnp.abs(out_p - ref)))
    assert jnp.allclose(out_p, ref, atol=1e-4, rtol=1e-4), err_p

    # Fast path (bf16 MXU + f32 accumulate, approximate reciprocal): loose check.
    out_f = relative_global_attention(x, wq, bq, wk, bk, wv, bv, er,
                                      num_heads=H, max_len=MAX_LEN, precise=False)
    out_f = jax.block_until_ready(out_f)
    assert out_f.shape == (B, S, D)
    err_f = float(jnp.max(jnp.abs(out_f - ref)))
    assert jnp.allclose(out_f, ref, atol=5e-2, rtol=5e-2), err_f

    print("KERNEL_OK")
</pallas_src>

<mosaic_0001>
module attributes {stable_mosaic.version = 11 : i64} {
  func.func @_rga_kernel(%arg0: i32, %arg1: memref<1x8x32xf32, #tpu.memory_space<vmem>>, %arg2: memref<32x96xf32, #tpu.memory_space<vmem>>, %arg3: memref<1x96xf32, #tpu.memory_space<vmem>>, %arg4: memref<8x8xf32, #tpu.memory_space<vmem>>, %arg5: memref<1x8x32xf32, #tpu.memory_space<vmem>>) attributes {dimension_semantics = [#tpu.dimension_semantics<parallel>], iteration_bounds = array<i64: 2>, scalar_prefetch = 0 : i64, scratch_operands = 0 : i64, tpu.core_type = #tpu.core_type<tc>, window_params = [{transform_indices = @transform_0, window_bounds = array<i64: 1, 8, 32>}, {pipeline_mode = #tpu.pipeline_mode<synchronous>, transform_indices = @transform_1, window_bounds = array<i64: 32, 96>}, {pipeline_mode = #tpu.pipeline_mode<synchronous>, transform_indices = @transform_2, window_bounds = array<i64: 1, 96>}, {pipeline_mode = #tpu.pipeline_mode<synchronous>, transform_indices = @transform_3, window_bounds = array<i64: 8, 8>}, {transform_indices = @transform_4, window_bounds = array<i64: 1, 8, 32>}]} {
    %c0 = arith.constant 0 : index
    %c0_0 = arith.constant 0 : index
    %c0_1 = arith.constant 0 : index
    %0 = vector.load %arg1[%c0, %c0_0, %c0_1] : memref<1x8x32xf32, #tpu.memory_space<vmem>>, vector<1x8x32xf32>
    %1 = vector.shape_cast %0 : vector<1x8x32xf32> to vector<8x32xf32>
    %c0_2 = arith.constant 0 : index
    %c0_3 = arith.constant 0 : index
    %2 = vector.load %arg2[%c0_2, %c0_3] : memref<32x96xf32, #tpu.memory_space<vmem>>, vector<32x96xf32>
    %cst = arith.constant dense<0.000000e+00> : vector<8x96xf32>
    %3 = tpu.matmul %1, %2, %cst {dimension_numbers = #tpu.dot_dimension_numbers<[1], [0], [0], [1], [0, 0, 1, 1], [], []>} : vector<8x32xf32>, vector<32x96xf32>, vector<8x96xf32> -> vector<8x96xf32>
    %c0_4 = arith.constant 0 : index
    %c0_5 = arith.constant 0 : index
    %4 = vector.load %arg3[%c0_4, %c0_5] : memref<1x96xf32, #tpu.memory_space<vmem>>, vector<1x96xf32>
    %5 = vector.broadcast %4 : vector<1x96xf32> to vector<8x96xf32>
    %6 = arith.addf %3, %5 : vector<8x96xf32>
    %7 = tpu.iota {dimensions = array<i32: 0>} : vector<8x8xi32>
    %8 = tpu.iota {dimensions = array<i32: 1>} : vector<8x8xi32>
    %9 = arith.cmpi sle, %8, %7 : vector<8x8xi32>
    %c0_6 = arith.constant 0 : index
    %c0_7 = arith.constant 0 : index
    %10 = vector.load %arg4[%c0_6, %c0_7] : memref<8x8xf32, #tpu.memory_space<vmem>>, vector<8x8xf32>
    %11 = vector.extract_strided_slice %6 {offsets = [0, 0], sizes = [8, 8], strides = [1, 1]} : vector<8x96xf32> to vector<8x8xf32>
    %12 = vector.extract_strided_slice %6 {offsets = [0, 32], sizes = [8, 8], strides = [1, 1]} : vector<8x96xf32> to vector<8x8xf32>
    %13 = tpu.transpose %12, [1, 0] : vector<8x8xf32> -> vector<8x8xf32>
    %14 = vector.extract_strided_slice %6 {offsets = [0, 64], sizes = [8, 8], strides = [1, 1]} : vector<8x96xf32> to vector<8x8xf32>
    %cst_8 = arith.constant dense<0.000000e+00> : vector<8x8xf32>
    %15 = tpu.matmul %11, %10, %cst_8 {dimension_numbers = #tpu.dot_dimension_numbers<[1], [0], [0], [1], [0, 0, 1, 1], [], []>} : vector<8x8xf32>, vector<8x8xf32>, vector<8x8xf32> -> vector<8x8xf32>
    %16 = arith.subi %8, %7 : vector<8x8xi32>
    %c7_i32 = arith.constant 7 : i32
    %17 = vector.broadcast %c7_i32 : i32 to vector<8x8xi32>
    %18 = arith.addi %16, %17 : vector<8x8xi32>
    %c0_i32 = arith.constant 0 : i32
    %c7_i32_9 = arith.constant 7 : i32
    %19 = vector.broadcast %c0_i32 : i32 to vector<8x8xi32>
    %20 = arith.maxsi %19, %18 : vector<8x8xi32>
    %21 = vector.broadcast %c7_i32_9 : i32 to vector<8x8xi32>
    %22 = arith.minsi %21, %20 : vector<8x8xi32>
    %23 = vector.shape_cast %22 : vector<8x8xi32> to vector<8x8x1xi32>
    %24 = vector.shape_cast %23 : vector<8x8x1xi32> to vector<8x8xi32>
    %25 = tpu.dynamic_gather %15[%24] in [1] : vector<8x8xf32>, vector<8x8xi32> -> vector<8x8xf32>
    %cst_10 = arith.constant dense<0.000000e+00> : vector<8x8xf32>
    %26 = tpu.matmul %11, %13, %cst_10 {dimension_numbers = #tpu.dot_dimension_numbers<[1], [0], [0], [1], [0, 0, 1, 1], [], []>} : vector<8x8xf32>, vector<8x8xf32>, vector<8x8xf32> -> vector<8x8xf32>
    %27 = arith.addf %26, %25 : vector<8x8xf32>
    %cst_11 = arith.constant 0xFF800000 : f32
    %28 = vector.broadcast %cst_11 : f32 to vector<8x8xf32>
    %29 = arith.select %9, %27, %28 : vector<8x8xi1>, vector<8x8xf32>
    %cst_12 = arith.constant dense<0xFF800000> : vector<8xf32>
    %30 = vector.multi_reduction <maximumf>, %29, %cst_12 [1] : vector<8x8xf32> to vector<8xf32>
    %31 = vector.shape_cast %30 : vector<8xf32> to vector<8x1xf32>
    %32 = vector.broadcast %31 : vector<8x1xf32> to vector<8x8xf32>
    %33 = arith.subf %29, %32 : vector<8x8xf32>
    %34 = math.exp %33 : vector<8x8xf32>
    %cst_13 = arith.constant dense<0.000000e+00> : vector<8xf32>
    %35 = vector.multi_reduction <add>, %34, %cst_13 [1] : vector<8x8xf32> to vector<8xf32>
    %36 = vector.shape_cast %35 : vector<8xf32> to vector<8x1xf32>
    %37 = vector.broadcast %36 : vector<8x1xf32> to vector<8x8xf32>
    %38 = arith.divf %34, %37 : vector<8x8xf32>
    %cst_14 = arith.constant dense<0.000000e+00> : vector<8x8xf32>
    %39 = tpu.matmul %38, %14, %cst_14 {dimension_numbers = #tpu.dot_dimension_numbers<[1], [0], [0], [1], [0, 0, 1, 1], [], []>} : vector<8x8xf32>, vector<8x8xf32>, vector<8x8xf32> -> vector<8x8xf32>
    %c0_15 = arith.constant 0 : index
    %c0_16 = arith.constant 0 : index
    %c0_17 = arith.constant 0 : index
    %40 = vector.load %arg5[%c0_15, %c0_16, %c0_17] : memref<1x8x32xf32, #tpu.memory_space<vmem>>, vector<1x8x8xf32>
    %41 = vector.shape_cast %40 : vector<1x8x8xf32> to vector<8x8xf32>
    %42 = vector.shape_cast %39 : vector<8x8xf32> to vector<1x8x8xf32>
    tpu.vector_store %arg5[%c0_15, %c0_16, %c0_17], %42 {strides = array<i32>} : memref<1x8x32xf32, #tpu.memory_space<vmem>>, vector<1x8x8xf32>,
    %43 = vector.extract_strided_slice %6 {offsets = [0, 8], sizes = [8, 8], strides = [1, 1]} : vector<8x96xf32> to vector<8x8xf32>
    %44 = vector.extract_strided_slice %6 {offsets = [0, 40], sizes = [8, 8], strides = [1, 1]} : vector<8x96xf32> to vector<8x8xf32>
    %45 = tpu.transpose %44, [1, 0] : vector<8x8xf32> -> vector<8x8xf32>
    %46 = vector.extract_strided_slice %6 {offsets = [0, 72], sizes = [8, 8], strides = [1, 1]} : vector<8x96xf32> to vector<8x8xf32>
    %cst_18 = arith.constant dense<0.000000e+00> : vector<8x8xf32>
    %47 = tpu.matmul %43, %10, %cst_18 {dimension_numbers = #tpu.dot_dimension_numbers<[1], [0], [0], [1], [0, 0, 1, 1], [], []>} : vector<8x8xf32>, vector<8x8xf32>, vector<8x8xf32> -> vector<8x8xf32>
    %48 = arith.subi %8, %7 : vector<8x8xi32>
    %c7_i32_19 = arith.constant 7 : i32
    %49 = vector.broadcast %c7_i32_19 : i32 to vector<8x8xi32>
    %50 = arith.addi %48, %49 : vector<8x8xi32>
    %c0_i32_20 = arith.constant 0 : i32
    %c7_i32_21 = arith.constant 7 : i32
    %51 = vector.broadcast %c0_i32_20 : i32 to vector<8x8xi32>
    %52 = arith.maxsi %51, %50 : vector<8x8xi32>
    %53 = vector.broadcast %c7_i32_21 : i32 to vector<8x8xi32>
    %54 = arith.minsi %53, %52 : vector<8x8xi32>
    %55 = vector.shape_cast %54 : vector<8x8xi32> to vector<8x8x1xi32>
    %56 = vector.shape_cast %55 : vector<8x8x1xi32> to vector<8x8xi32>
    %57 = tpu.dynamic_gather %47[%56] in [1] : vector<8x8xf32>, vector<8x8xi32> -> vector<8x8xf32>
    %cst_22 = arith.constant dense<0.000000e+00> : vector<8x8xf32>
    %58 = tpu.matmul %43, %45, %cst_22 {dimension_numbers = #tpu.dot_dimension_numbers<[1], [0], [0], [1], [0, 0, 1, 1], [], []>} : vector<8x8xf32>, vector<8x8xf32>, vector<8x8xf32> -> vector<8x8xf32>
    %59 = arith.addf %58, %57 : vector<8x8xf32>
    %cst_23 = arith.constant 0xFF800000 : f32
    %60 = vector.broadcast %cst_23 : f32 to vector<8x8xf32>
    %61 = arith.select %9, %59, %60 : vector<8x8xi1>, vector<8x8xf32>
    %cst_24 = arith.constant dense<0xFF800000> : vector<8xf32>
    %62 = vector.multi_reduction <maximumf>, %61, %cst_24 [1] : vector<8x8xf32> to vector<8xf32>
    %63 = vector.shape_cast %62 : vector<8xf32> to vector<8x1xf32>
    %64 = vector.broadcast %63 : vector<8x1xf32> to vector<8x8xf32>
    %65 = arith.subf %61, %64 : vector<8x8xf32>
    %66 = math.exp %65 : vector<8x8xf32>
    %cst_25 = arith.constant dense<0.000000e+00> : vector<8xf32>
    %67 = vector.multi_reduction <add>, %66, %cst_25 [1] : vector<8x8xf32> to vector<8xf32>
    %68 = vector.shape_cast %67 : vector<8xf32> to vector<8x1xf32>
    %69 = vector.broadcast %68 : vector<8x1xf32> to vector<8x8xf32>
    %70 = arith.divf %66, %69 : vector<8x8xf32>
    %cst_26 = arith.constant dense<0.000000e+00> : vector<8x8xf32>
    %71 = tpu.matmul %70, %46, %cst_26 {dimension_numbers = #tpu.dot_dimension_numbers<[1], [0], [0], [1], [0, 0, 1, 1], [], []>} : vector<8x8xf32>, vector<8x8xf32>, vector<8x8xf32> -> vector<8x8xf32>
    %c0_27 = arith.constant 0 : index
    %c0_28 = arith.constant 0 : index
    %c8 = arith.constant 8 : index
    %72 = vector.load %arg5[%c0_27, %c0_28, %c8] : memref<1x8x32xf32, #tpu.memory_space<vmem>>, vector<1x8x8xf32>
    %73 = vector.shape_cast %72 : vector<1x8x8xf32> to vector<8x8xf32>
    %74 = vector.shape_cast %71 : vector<8x8xf32> to vector<1x8x8xf32>
    tpu.vector_store %arg5[%c0_27, %c0_28, %c8], %74 {strides = array<i32>} : memref<1x8x32xf32, #tpu.memory_space<vmem>>, vector<1x8x8xf32>,
    %75 = vector.extract_strided_slice %6 {offsets = [0, 16], sizes = [8, 8], strides = [1, 1]} : vector<8x96xf32> to vector<8x8xf32>
    %76 = vector.extract_strided_slice %6 {offsets = [0, 48], sizes = [8, 8], strides = [1, 1]} : vector<8x96xf32> to vector<8x8xf32>
    %77 = tpu.transpose %76, [1, 0] : vector<8x8xf32> -> vector<8x8xf32>
    %78 = vector.extract_strided_slice %6 {offsets = [0, 80], sizes = [8, 8], strides = [1, 1]} : vector<8x96xf32> to vector<8x8xf32>
    %cst_29 = arith.constant dense<0.000000e+00> : vector<8x8xf32>
    %79 = tpu.matmul %75, %10, %cst_29 {dimension_numbers = #tpu.dot_dimension_numbers<[1], [0], [0], [1], [0, 0, 1, 1], [], []>} : vector<8x8xf32>, vector<8x8xf32>, vector<8x8xf32> -> vector<8x8xf32>
    %80 = arith.subi %8, %7 : vector<8x8xi32>
    %c7_i32_30 = arith.constant 7 : i32
    %81 = vector.broadcast %c7_i32_30 : i32 to vector<8x8xi32>
    %82 = arith.addi %80, %81 : vector<8x8xi32>
    %c0_i32_31 = arith.constant 0 : i32
    %c7_i32_32 = arith.constant 7 : i32
    %83 = vector.broadcast %c0_i32_31 : i32 to vector<8x8xi32>
    %84 = arith.maxsi %83, %82 : vector<8x8xi32>
    %85 = vector.broadcast %c7_i32_32 : i32 to vector<8x8xi32>
    %86 = arith.minsi %85, %84 : vector<8x8xi32>
    %87 = vector.shape_cast %86 : vector<8x8xi32> to vector<8x8x1xi32>
    %88 = vector.shape_cast %87 : vector<8x8x1xi32> to vector<8x8xi32>
    %89 = tpu.dynamic_gather %79[%88] in [1] : vector<8x8xf32>, vector<8x8xi32> -> vector<8x8xf32>
    %cst_33 = arith.constant dense<0.000000e+00> : vector<8x8xf32>
    %90 = tpu.matmul %75, %77, %cst_33 {dimension_numbers = #tpu.dot_dimension_numbers<[1], [0], [0], [1], [0, 0, 1, 1], [], []>} : vector<8x8xf32>, vector<8x8xf32>, vector<8x8xf32> -> vector<8x8xf32>
    %91 = arith.addf %90, %89 : vector<8x8xf32>
    %cst_34 = arith.constant 0xFF800000 : f32
    %92 = vector.broadcast %cst_34 : f32 to vector<8x8xf32>
    %93 = arith.select %9, %91, %92 : vector<8x8xi1>, vector<8x8xf32>
    %cst_35 = arith.constant dense<0xFF800000> : vector<8xf32>
    %94 = vector.multi_reduction <maximumf>, %93, %cst_35 [1] : vector<8x8xf32> to vector<8xf32>
    %95 = vector.shape_cast %94 : vector<8xf32> to vector<8x1xf32>
    %96 = vector.broadcast %95 : vector<8x1xf32> to vector<8x8xf32>
    %97 = arith.subf %93, %96 : vector<8x8xf32>
    %98 = math.exp %97 : vector<8x8xf32>
    %cst_36 = arith.constant dense<0.000000e+00> : vector<8xf32>
    %99 = vector.multi_reduction <add>, %98, %cst_36 [1] : vector<8x8xf32> to vector<8xf32>
    %100 = vector.shape_cast %99 : vector<8xf32> to vector<8x1xf32>
    %101 = vector.broadcast %100 : vector<8x1xf32> to vector<8x8xf32>
    %102 = arith.divf %98, %101 : vector<8x8xf32>
    %cst_37 = arith.constant dense<0.000000e+00> : vector<8x8xf32>
    %103 = tpu.matmul %102, %78, %cst_37 {dimension_numbers = #tpu.dot_dimension_numbers<[1], [0], [0], [1], [0, 0, 1, 1], [], []>} : vector<8x8xf32>, vector<8x8xf32>, vector<8x8xf32> -> vector<8x8xf32>
    %c0_38 = arith.constant 0 : index
    %c0_39 = arith.constant 0 : index
    %c16 = arith.constant 16 : index
    %104 = vector.load %arg5[%c0_38, %c0_39, %c16] : memref<1x8x32xf32, #tpu.memory_space<vmem>>, vector<1x8x8xf32>
    %105 = vector.shape_cast %104 : vector<1x8x8xf32> to vector<8x8xf32>
    %106 = vector.shape_cast %103 : vector<8x8xf32> to vector<1x8x8xf32>
    tpu.vector_store %arg5[%c0_38, %c0_39, %c16], %106 {strides = array<i32>} : memref<1x8x32xf32, #tpu.memory_space<vmem>>, vector<1x8x8xf32>,
    %107 = vector.extract_strided_slice %6 {offsets = [0, 24], sizes = [8, 8], strides = [1, 1]} : vector<8x96xf32> to vector<8x8xf32>
    %108 = vector.extract_strided_slice %6 {offsets = [0, 56], sizes = [8, 8], strides = [1, 1]} : vector<8x96xf32> to vector<8x8xf32>
    %109 = tpu.transpose %108, [1, 0] : vector<8x8xf32> -> vector<8x8xf32>
    %110 = vector.extract_strided_slice %6 {offsets = [0, 88], sizes = [8, 8], strides = [1, 1]} : vector<8x96xf32> to vector<8x8xf32>
    %cst_40 = arith.constant dense<0.000000e+00> : vector<8x8xf32>
    %111 = tpu.matmul %107, %10, %cst_40 {dimension_numbers = #tpu.dot_dimension_numbers<[1], [0], [0], [1], [0, 0, 1, 1], [], []>} : vector<8x8xf32>, vector<8x8xf32>, vector<8x8xf32> -> vector<8x8xf32>
    %112 = arith.subi %8, %7 : vector<8x8xi32>
    %c7_i32_41 = arith.constant 7 : i32
    %113 = vector.broadcast %c7_i32_41 : i32 to vector<8x8xi32>
    %114 = arith.addi %112, %113 : vector<8x8xi32>
    %c0_i32_42 = arith.constant 0 : i32
    %c7_i32_43 = arith.constant 7 : i32
    %115 = vector.broadcast %c0_i32_42 : i32 to vector<8x8xi32>
    %116 = arith.maxsi %115, %114 : vector<8x8xi32>
    %117 = vector.broadcast %c7_i32_43 : i32 to vector<8x8xi32>
    %118 = arith.minsi %117, %116 : vector<8x8xi32>
    %119 = vector.shape_cast %118 : vector<8x8xi32> to vector<8x8x1xi32>
    %120 = vector.shape_cast %119 : vector<8x8x1xi32> to vector<8x8xi32>
    %121 = tpu.dynamic_gather %111[%120] in [1] : vector<8x8xf32>, vector<8x8xi32> -> vector<8x8xf32>
    %cst_44 = arith.constant dense<0.000000e+00> : vector<8x8xf32>
    %122 = tpu.matmul %107, %109, %cst_44 {dimension_numbers = #tpu.dot_dimension_numbers<[1], [0], [0], [1], [0, 0, 1, 1], [], []>} : vector<8x8xf32>, vector<8x8xf32>, vector<8x8xf32> -> vector<8x8xf32>
    %123 = arith.addf %122, %121 : vector<8x8xf32>
    %cst_45 = arith.constant 0xFF800000 : f32
    %124 = vector.broadcast %cst_45 : f32 to vector<8x8xf32>
    %125 = arith.select %9, %123, %124 : vector<8x8xi1>, vector<8x8xf32>
    %cst_46 = arith.constant dense<0xFF800000> : vector<8xf32>
    %126 = vector.multi_reduction <maximumf>, %125, %cst_46 [1] : vector<8x8xf32> to vector<8xf32>
    %127 = vector.shape_cast %126 : vector<8xf32> to vector<8x1xf32>
    %128 = vector.broadcast %127 : vector<8x1xf32> to vector<8x8xf32>
    %129 = arith.subf %125, %128 : vector<8x8xf32>
    %130 = math.exp %129 : vector<8x8xf32>
    %cst_47 = arith.constant dense<0.000000e+00> : vector<8xf32>
    %131 = vector.multi_reduction <add>, %130, %cst_47 [1] : vector<8x8xf32> to vector<8xf32>
    %132 = vector.shape_cast %131 : vector<8xf32> to vector<8x1xf32>
    %133 = vector.broadcast %132 : vector<8x1xf32> to vector<8x8xf32>
    %134 = arith.divf %130, %133 : vector<8x8xf32>
    %cst_48 = arith.constant dense<0.000000e+00> : vector<8x8xf32>
    %135 = tpu.matmul %134, %110, %cst_48 {dimension_numbers = #tpu.dot_dimension_numbers<[1], [0], [0], [1], [0, 0, 1, 1], [], []>} : vector<8x8xf32>, vector<8x8xf32>, vector<8x8xf32> -> vector<8x8xf32>
    %c0_49 = arith.constant 0 : index
    %c0_50 = arith.constant 0 : index
    %c24 = arith.constant 24 : index
    %136 = vector.load %arg5[%c0_49, %c0_50, %c24] : memref<1x8x32xf32, #tpu.memory_space<vmem>>, vector<1x8x8xf32>
    %137 = vector.shape_cast %136 : vector<1x8x8xf32> to vector<8x8xf32>
    %138 = vector.shape_cast %135 : vector<8x8xf32> to vector<1x8x8xf32>
    tpu.vector_store %arg5[%c0_49, %c0_50, %c24], %138 {strides = array<i32>} : memref<1x8x32xf32, #tpu.memory_space<vmem>>, vector<1x8x8xf32>,
    return
  }
  func.func @transform_0(%arg0: i32) -> (i32, i32, i32) {
    %c0_i32 = arith.constant 0 : i32
    %c0_i32_0 = arith.constant 0 : i32
    %c0_i32_1 = arith.constant 0 : i32
    return %arg0, %c0_i32, %c0_i32_0 : i32, i32, i32
  }
  func.func @transform_1(%arg0: i32) -> (i32, i32) {
    %c0_i32 = arith.constant 0 : i32
    %c0_i32_0 = arith.constant 0 : i32
    %c0_i32_1 = arith.constant 0 : i32
    return %c0_i32, %c0_i32_0 : i32, i32
  }
  func.func @transform_2(%arg0: i32) -> (i32, i32) {
    %c0_i32 = arith.constant 0 : i32
    %c0_i32_0 = arith.constant 0 : i32
    %c0_i32_1 = arith.constant 0 : i32
    return %c0_i32, %c0_i32_0 : i32, i32
  }
  func.func @transform_3(%arg0: i32) -> (i32, i32) {
    %c0_i32 = arith.constant 0 : i32
    %c0_i32_0 = arith.constant 0 : i32
    %c0_i32_1 = arith.constant 0 : i32
    return %c0_i32, %c0_i32_0 : i32, i32
  }
  func.func @transform_4(%arg0: i32) -> (i32, i32, i32) {
    %c0_i32 = arith.constant 0 : i32
    %c0_i32_0 = arith.constant 0 : i32
    %c0_i32_1 = arith.constant 0 : i32
    return %arg0, %c0_i32, %c0_i32_0 : i32, i32, i32
  }
}

module attributes {stable_mosaic.version = 11 : i64} {
  func.func @_rga_kernel(%arg0: i32, %arg1: memref<1x8x32xf32, #tpu.memory_space<vmem>>, %arg2: memref<32x96xf32, #tpu.memory_space<vmem>>, %arg3: memref<1x96xf32, #tpu.memory_space<vmem>>, %arg4: memref<8x8xf32, #tpu.memory_space<vmem>>, %arg5: memref<1x8x32xf32, #tpu.memory_space<vmem>>) attributes {dimension_semantics = [#tpu.dimension_semantics<parallel>], iteration_bounds = array<i64: 2>, scalar_prefetch = 0 : i64, scratch_operands = 0 : i64, tpu.core_type = #tpu.core_type<tc>, window_params = [{transform_indices = @transform_0, window_bounds = array<i64: 1, 8, 32>}, {pipeline_mode = #tpu.pipeline_mode<synchronous>, transform_indices = @transform_1, window_bounds = array<i64: 32, 96>}, {pipeline_mode = #tpu.pipeline_mode<synchronous>, transform_indices = @transform_2, window_bounds = array<i64: 1, 96>}, {pipeline_mode = #tpu.pipeline_mode<synchronous>, transform_indices = @transform_3, window_bounds = array<i64: 8, 8>}, {transform_indices = @transform_4, window_bounds = array<i64: 1, 8, 32>}]} {
    %c0 = arith.constant 0 : index
    %c0_0 = arith.constant 0 : index
    %c0_1 = arith.constant 0 : index
    %0 = vector.load %arg1[%c0, %c0_0, %c0_1] : memref<1x8x32xf32, #tpu.memory_space<vmem>>, vector<1x8x32xf32>
    %1 = vector.shape_cast %0 : vector<1x8x32xf32> to vector<8x32xf32>
    %c0_2 = arith.constant 0 : index
    %c0_3 = arith.constant 0 : index
    %2 = vector.load %arg2[%c0_2, %c0_3] : memref<32x96xf32, #tpu.memory_space<vmem>>, vector<32x96xf32>
    %cst = arith.constant dense<0.000000e+00> : vector<8x96xf32>
    %3 = tpu.matmul %1, %2, %cst {dimension_numbers = #tpu.dot_dimension_numbers<[1], [0], [0], [1], [0, 0, 1, 1], [], []>} : vector<8x32xf32>, vector<32x96xf32>, vector<8x96xf32> -> vector<8x96xf32>
    %c0_4 = arith.constant 0 : index
    %c0_5 = arith.constant 0 : index
    %4 = vector.load %arg3[%c0_4, %c0_5] : memref<1x96xf32, #tpu.memory_space<vmem>>, vector<1x96xf32>
    %5 = vector.broadcast %4 : vector<1x96xf32> to vector<8x96xf32>
    %6 = arith.addf %3, %5 : vector<8x96xf32>
    %7 = tpu.iota {dimensions = array<i32: 0>} : vector<8x8xi32>
    %8 = tpu.iota {dimensions = array<i32: 1>} : vector<8x8xi32>
    %9 = arith.cmpi sle, %8, %7 : vector<8x8xi32>
    %c0_6 = arith.constant 0 : index
    %c0_7 = arith.constant 0 : index
    %10 = vector.load %arg4[%c0_6, %c0_7] : memref<8x8xf32, #tpu.memory_space<vmem>>, vector<8x8xf32>
    %11 = vector.extract_strided_slice %6 {offsets = [0, 0], sizes = [8, 8], strides = [1, 1]} : vector<8x96xf32> to vector<8x8xf32>
    %12 = vector.extract_strided_slice %6 {offsets = [0, 32], sizes = [8, 8], strides = [1, 1]} : vector<8x96xf32> to vector<8x8xf32>
    %13 = tpu.transpose %12, [1, 0] : vector<8x8xf32> -> vector<8x8xf32>
    %14 = vector.extract_strided_slice %6 {offsets = [0, 64], sizes = [8, 8], strides = [1, 1]} : vector<8x96xf32> to vector<8x8xf32>
    %cst_8 = arith.constant dense<0.000000e+00> : vector<8x8xf32>
    %15 = tpu.matmul %11, %10, %cst_8 {dimension_numbers = #tpu.dot_dimension_numbers<[1], [0], [0], [1], [0, 0, 1, 1], [], []>} : vector<8x8xf32>, vector<8x8xf32>, vector<8x8xf32> -> vector<8x8xf32>
    %c0_i32 = arith.constant 0 : i32
    %16 = arith.sitofp %c0_i32 : i32 to f32
    %17 = vector.broadcast %16 : f32 to vector<8x1xf32>
    %18 = tpu.concatenate %17, %15 in 1 : vector<8x1xf32>, vector<8x8xf32> -> vector<8x9xf32>
    %19 = vector.shape_cast %18 : vector<8x9xf32> to vector<9x8xf32>
    %20 = vector.extract_strided_slice %19 {offsets = [1, 0], sizes = [8, 8], strides = [1, 1]} : vector<9x8xf32> to vector<8x8xf32>
    %cst_9 = arith.constant dense<0.000000e+00> : vector<8x8xf32>
    %21 = tpu.matmul %11, %13, %cst_9 {dimension_numbers = #tpu.dot_dimension_numbers<[1], [0], [0], [1], [0, 0, 1, 1], [], []>} : vector<8x8xf32>, vector<8x8xf32>, vector<8x8xf32> -> vector<8x8xf32>
    %22 = arith.addf %21, %20 : vector<8x8xf32>
    %cst_10 = arith.constant 0xFF800000 : f32
    %23 = vector.broadcast %cst_10 : f32 to vector<8x8xf32>
    %24 = arith.select %9, %22, %23 : vector<8x8xi1>, vector<8x8xf32>
    %cst_11 = arith.constant dense<0xFF800000> : vector<8xf32>
    %25 = vector.multi_reduction <maximumf>, %24, %cst_11 [1] : vector<8x8xf32> to vector<8xf32>
    %26 = vector.shape_cast %25 : vector<8xf32> to vector<8x1xf32>
    %27 = vector.broadcast %26 : vector<8x1xf32> to vector<8x8xf32>
    %28 = arith.subf %24, %27 : vector<8x8xf32>
    %29 = math.exp %28 : vector<8x8xf32>
    %cst_12 = arith.constant dense<0.000000e+00> : vector<8xf32>
    %30 = vector.multi_reduction <add>, %29, %cst_12 [1] : vector<8x8xf32> to vector<8xf32>
    %31 = vector.shape_cast %30 : vector<8xf32> to vector<8x1xf32>
    %32 = vector.broadcast %31 : vector<8x1xf32> to vector<8x8xf32>
    %33 = arith.divf %29, %32 : vector<8x8xf32>
    %cst_13 = arith.constant dense<0.000000e+00> : vector<8x8xf32>
    %34 = tpu.matmul %33, %14, %cst_13 {dimension_numbers = #tpu.dot_dimension_numbers<[1], [0], [0], [1], [0, 0, 1, 1], [], []>} : vector<8x8xf32>, vector<8x8xf32>, vector<8x8xf32> -> vector<8x8xf32>
    %c0_14 = arith.constant 0 : index
    %c0_15 = arith.constant 0 : index
    %c0_16 = arith.constant 0 : index
    %35 = vector.load %arg5[%c0_14, %c0_15, %c0_16] : memref<1x8x32xf32, #tpu.memory_space<vmem>>, vector<1x8x8xf32>
    %36 = vector.shape_cast %35 : vector<1x8x8xf32> to vector<8x8xf32>
    %37 = vector.shape_cast %34 : vector<8x8xf32> to vector<1x8x8xf32>
    tpu.vector_store %arg5[%c0_14, %c0_15, %c0_16], %37 {strides = array<i32>} : memref<1x8x32xf32, #tpu.memory_space<vmem>>, vector<1x8x8xf32>,
    %38 = vector.extract_strided_slice %6 {offsets = [0, 8], sizes = [8, 8], strides = [1, 1]} : vector<8x96xf32> to vector<8x8xf32>
    %39 = vector.extract_strided_slice %6 {offsets = [0, 40], sizes = [8, 8], strides = [1, 1]} : vector<8x96xf32> to vector<8x8xf32>
    %40 = tpu.transpose %39, [1, 0] : vector<8x8xf32> -> vector<8x8xf32>
    %41 = vector.extract_strided_slice %6 {offsets = [0, 72], sizes = [8, 8], strides = [1, 1]} : vector<8x96xf32> to vector<8x8xf32>
    %cst_17 = arith.constant dense<0.000000e+00> : vector<8x8xf32>
    %42 = tpu.matmul %38, %10, %cst_17 {dimension_numbers = #tpu.dot_dimension_numbers<[1], [0], [0], [1], [0, 0, 1, 1], [], []>} : vector<8x8xf32>, vector<8x8xf32>, vector<8x8xf32> -> vector<8x8xf32>
    %c0_i32_18 = arith.constant 0 : i32
    %43 = arith.sitofp %c0_i32_18 : i32 to f32
    %44 = vector.broadcast %43 : f32 to vector<8x1xf32>
    %45 = tpu.concatenate %44, %42 in 1 : vector<8x1xf32>, vector<8x8xf32> -> vector<8x9xf32>
    %46 = vector.shape_cast %45 : vector<8x9xf32> to vector<9x8xf32>
    %47 = vector.extract_strided_slice %46 {offsets = [1, 0], sizes = [8, 8], strides = [1, 1]} : vector<9x8xf32> to vector<8x8xf32>
    %cst_19 = arith.constant dense<0.000000e+00> : vector<8x8xf32>
    %48 = tpu.matmul %38, %40, %cst_19 {dimension_numbers = #tpu.dot_dimension_numbers<[1], [0], [0], [1], [0, 0, 1, 1], [], []>} : vector<8x8xf32>, vector<8x8xf32>, vector<8x8xf32> -> vector<8x8xf32>
    %49 = arith.addf %48, %47 : vector<8x8xf32>
    %cst_20 = arith.constant 0xFF800000 : f32
    %50 = vector.broadcast %cst_20 : f32 to vector<8x8xf32>
    %51 = arith.select %9, %49, %50 : vector<8x8xi1>, vector<8x8xf32>
    %cst_21 = arith.constant dense<0xFF800000> : vector<8xf32>
    %52 = vector.multi_reduction <maximumf>, %51, %cst_21 [1] : vector<8x8xf32> to vector<8xf32>
    %53 = vector.shape_cast %52 : vector<8xf32> to vector<8x1xf32>
    %54 = vector.broadcast %53 : vector<8x1xf32> to vector<8x8xf32>
    %55 = arith.subf %51, %54 : vector<8x8xf32>
    %56 = math.exp %55 : vector<8x8xf32>
    %cst_22 = arith.constant dense<0.000000e+00> : vector<8xf32>
    %57 = vector.multi_reduction <add>, %56, %cst_22 [1] : vector<8x8xf32> to vector<8xf32>
    %58 = vector.shape_cast %57 : vector<8xf32> to vector<8x1xf32>
    %59 = vector.broadcast %58 : vector<8x1xf32> to vector<8x8xf32>
    %60 = arith.divf %56, %59 : vector<8x8xf32>
    %cst_23 = arith.constant dense<0.000000e+00> : vector<8x8xf32>
    %61 = tpu.matmul %60, %41, %cst_23 {dimension_numbers = #tpu.dot_dimension_numbers<[1], [0], [0], [1], [0, 0, 1, 1], [], []>} : vector<8x8xf32>, vector<8x8xf32>, vector<8x8xf32> -> vector<8x8xf32>
    %c0_24 = arith.constant 0 : index
    %c0_25 = arith.constant 0 : index
    %c8 = arith.constant 8 : index
    %62 = vector.load %arg5[%c0_24, %c0_25, %c8] : memref<1x8x32xf32, #tpu.memory_space<vmem>>, vector<1x8x8xf32>
    %63 = vector.shape_cast %62 : vector<1x8x8xf32> to vector<8x8xf32>
    %64 = vector.shape_cast %61 : vector<8x8xf32> to vector<1x8x8xf32>
    tpu.vector_store %arg5[%c0_24, %c0_25, %c8], %64 {strides = array<i32>} : memref<1x8x32xf32, #tpu.memory_space<vmem>>, vector<1x8x8xf32>,
    %65 = vector.extract_strided_slice %6 {offsets = [0, 16], sizes = [8, 8], strides = [1, 1]} : vector<8x96xf32> to vector<8x8xf32>
    %66 = vector.extract_strided_slice %6 {offsets = [0, 48], sizes = [8, 8], strides = [1, 1]} : vector<8x96xf32> to vector<8x8xf32>
    %67 = tpu.transpose %66, [1, 0] : vector<8x8xf32> -> vector<8x8xf32>
    %68 = vector.extract_strided_slice %6 {offsets = [0, 80], sizes = [8, 8], strides = [1, 1]} : vector<8x96xf32> to vector<8x8xf32>
    %cst_26 = arith.constant dense<0.000000e+00> : vector<8x8xf32>
    %69 = tpu.matmul %65, %10, %cst_26 {dimension_numbers = #tpu.dot_dimension_numbers<[1], [0], [0], [1], [0, 0, 1, 1], [], []>} : vector<8x8xf32>, vector<8x8xf32>, vector<8x8xf32> -> vector<8x8xf32>
    %c0_i32_27 = arith.constant 0 : i32
    %70 = arith.sitofp %c0_i32_27 : i32 to f32
    %71 = vector.broadcast %70 : f32 to vector<8x1xf32>
    %72 = tpu.concatenate %71, %69 in 1 : vector<8x1xf32>, vector<8x8xf32> -> vector<8x9xf32>
    %73 = vector.shape_cast %72 : vector<8x9xf32> to vector<9x8xf32>
    %74 = vector.extract_strided_slice %73 {offsets = [1, 0], sizes = [8, 8], strides = [1, 1]} : vector<9x8xf32> to vector<8x8xf32>
    %cst_28 = arith.constant dense<0.000000e+00> : vector<8x8xf32>
    %75 = tpu.matmul %65, %67, %cst_28 {dimension_numbers = #tpu.dot_dimension_numbers<[1], [0], [0], [1], [0, 0, 1, 1], [], []>} : vector<8x8xf32>, vector<8x8xf32>, vector<8x8xf32> -> vector<8x8xf32>
    %76 = arith.addf %75, %74 : vector<8x8xf32>
    %cst_29 = arith.constant 0xFF800000 : f32
    %77 = vector.broadcast %cst_29 : f32 to vector<8x8xf32>
    %78 = arith.select %9, %76, %77 : vector<8x8xi1>, vector<8x8xf32>
    %cst_30 = arith.constant dense<0xFF800000> : vector<8xf32>
    %79 = vector.multi_reduction <maximumf>, %78, %cst_30 [1] : vector<8x8xf32> to vector<8xf32>
    %80 = vector.shape_cast %79 : vector<8xf32> to vector<8x1xf32>
    %81 = vector.broadcast %80 : vector<8x1xf32> to vector<8x8xf32>
    %82 = arith.subf %78, %81 : vector<8x8xf32>
    %83 = math.exp %82 : vector<8x8xf32>
    %cst_31 = arith.constant dense<0.000000e+00> : vector<8xf32>
    %84 = vector.multi_reduction <add>, %83, %cst_31 [1] : vector<8x8xf32> to vector<8xf32>
    %85 = vector.shape_cast %84 : vector<8xf32> to vector<8x1xf32>
    %86 = vector.broadcast %85 : vector<8x1xf32> to vector<8x8xf32>
    %87 = arith.divf %83, %86 : vector<8x8xf32>
    %cst_32 = arith.constant dense<0.000000e+00> : vector<8x8xf32>
    %88 = tpu.matmul %87, %68, %cst_32 {dimension_numbers = #tpu.dot_dimension_numbers<[1], [0], [0], [1], [0, 0, 1, 1], [], []>} : vector<8x8xf32>, vector<8x8xf32>, vector<8x8xf32> -> vector<8x8xf32>
    %c0_33 = arith.constant 0 : index
    %c0_34 = arith.constant 0 : index
    %c16 = arith.constant 16 : index
    %89 = vector.load %arg5[%c0_33, %c0_34, %c16] : memref<1x8x32xf32, #tpu.memory_space<vmem>>, vector<1x8x8xf32>
    %90 = vector.shape_cast %89 : vector<1x8x8xf32> to vector<8x8xf32>
    %91 = vector.shape_cast %88 : vector<8x8xf32> to vector<1x8x8xf32>
    tpu.vector_store %arg5[%c0_33, %c0_34, %c16], %91 {strides = array<i32>} : memref<1x8x32xf32, #tpu.memory_space<vmem>>, vector<1x8x8xf32>,
    %92 = vector.extract_strided_slice %6 {offsets = [0, 24], sizes = [8, 8], strides = [1, 1]} : vector<8x96xf32> to vector<8x8xf32>
    %93 = vector.extract_strided_slice %6 {offsets = [0, 56], sizes = [8, 8], strides = [1, 1]} : vector<8x96xf32> to vector<8x8xf32>
    %94 = tpu.transpose %93, [1, 0] : vector<8x8xf32> -> vector<8x8xf32>
    %95 = vector.extract_strided_slice %6 {offsets = [0, 88], sizes = [8, 8], strides = [1, 1]} : vector<8x96xf32> to vector<8x8xf32>
    %cst_35 = arith.constant dense<0.000000e+00> : vector<8x8xf32>
    %96 = tpu.matmul %92, %10, %cst_35 {dimension_numbers = #tpu.dot_dimension_numbers<[1], [0], [0], [1], [0, 0, 1, 1], [], []>} : vector<8x8xf32>, vector<8x8xf32>, vector<8x8xf32> -> vector<8x8xf32>
    %c0_i32_36 = arith.constant 0 : i32
    %97 = arith.sitofp %c0_i32_36 : i32 to f32
    %98 = vector.broadcast %97 : f32 to vector<8x1xf32>
    %99 = tpu.concatenate %98, %96 in 1 : vector<8x1xf32>, vector<8x8xf32> -> vector<8x9xf32>
    %100 = vector.shape_cast %99 : vector<8x9xf32> to vector<9x8xf32>
    %101 = vector.extract_strided_slice %100 {offsets = [1, 0], sizes = [8, 8], strides = [1, 1]} : vector<9x8xf32> to vector<8x8xf32>
    %cst_37 = arith.constant dense<0.000000e+00> : vector<8x8xf32>
    %102 = tpu.matmul %92, %94, %cst_37 {dimension_numbers = #tpu.dot_dimension_numbers<[1], [0], [0], [1], [0, 0, 1, 1], [], []>} : vector<8x8xf32>, vector<8x8xf32>, vector<8x8xf32> -> vector<8x8xf32>
    %103 = arith.addf %102, %101 : vector<8x8xf32>
    %cst_38 = arith.constant 0xFF800000 : f32
    %104 = vector.broadcast %cst_38 : f32 to vector<8x8xf32>
    %105 = arith.select %9, %103, %104 : vector<8x8xi1>, vector<8x8xf32>
    %cst_39 = arith.constant dense<0xFF800000> : vector<8xf32>
    %106 = vector.multi_reduction <maximumf>, %105, %cst_39 [1] : vector<8x8xf32> to vector<8xf32>
    %107 = vector.shape_cast %106 : vector<8xf32> to vector<8x1xf32>
    %108 = vector.broadcast %107 : vector<8x1xf32> to vector<8x8xf32>
    %109 = arith.subf %105, %108 : vector<8x8xf32>
    %110 = math.exp %109 : vector<8x8xf32>
    %cst_40 = arith.constant dense<0.000000e+00> : vector<8xf32>
    %111 = vector.multi_reduction <add>, %110, %cst_40 [1] : vector<8x8xf32> to vector<8xf32>
    %112 = vector.shape_cast %111 : vector<8xf32> to vector<8x1xf32>
    %113 = vector.broadcast %112 : vector<8x1xf32> to vector<8x8xf32>
    %114 = arith.divf %110, %113 : vector<8x8xf32>
    %cst_41 = arith.constant dense<0.000000e+00> : vector<8x8xf32>
    %115 = tpu.matmul %114, %95, %cst_41 {dimension_numbers = #tpu.dot_dimension_numbers<[1], [0], [0], [1], [0, 0, 1, 1], [], []>} : vector<8x8xf32>, vector<8x8xf32>, vector<8x8xf32> -> vector<8x8xf32>
    %c0_42 = arith.constant 0 : index
    %c0_43 = arith.constant 0 : index
    %c24 = arith.constant 24 : index
    %116 = vector.load %arg5[%c0_42, %c0_43, %c24] : memref<1x8x32xf32, #tpu.memory_space<vmem>>, vector<1x8x8xf32>
    %117 = vector.shape_cast %116 : vector<1x8x8xf32> to vector<8x8xf32>
    %118 = vector.shape_cast %115 : vector<8x8xf32> to vector<1x8x8xf32>
    tpu.vector_store %arg5[%c0_42, %c0_43, %c24], %118 {strides = array<i32>} : memref<1x8x32xf32, #tpu.memory_space<vmem>>, vector<1x8x8xf32>,
    return
  }
  func.func @transform_0(%arg0: i32) -> (i32, i32, i32) {
    %c0_i32 = arith.constant 0 : i32
    %c0_i32_0 = arith.constant 0 : i32
    %c0_i32_1 = arith.constant 0 : i32
    return %arg0, %c0_i32, %c0_i32_0 : i32, i32, i32
  }
  func.func @transform_1(%arg0: i32) -> (i32, i32) {
    %c0_i32 = arith.constant 0 : i32
    %c0_i32_0 = arith.constant 0 : i32
    %c0_i32_1 = arith.constant 0 : i32
    return %c0_i32, %c0_i32_0 : i32, i32
  }
  func.func @transform_2(%arg0: i32) -> (i32, i32) {
    %c0_i32 = arith.constant 0 : i32
    %c0_i32_0 = arith.constant 0 : i32
    %c0_i32_1 = arith.constant 0 : i32
    return %c0_i32, %c0_i32_0 : i32, i32
  }
  func.func @transform_3(%arg0: i32) -> (i32, i32) {
    %c0_i32 = arith.constant 0 : i32
    %c0_i32_0 = arith.constant 0 : i32
    %c0_i32_1 = arith.constant 0 : i32
    return %c0_i32, %c0_i32_0 : i32, i32
  }
  func.func @transform_4(%arg0: i32) -> (i32, i32, i32) {
    %c0_i32 = arith.constant 0 : i32
    %c0_i32_0 = arith.constant 0 : i32
    %c0_i32_1 = arith.constant 0 : i32
    return %arg0, %c0_i32, %c0_i32_0 : i32, i32, i32
  }
}

module attributes {stable_mosaic.version = 11 : i64} {
  func.func @_rga_kernel(%arg0: i32, %arg1: memref<1x8x32xf32, #tpu.memory_space<vmem>>, %arg2: memref<32x96xf32, #tpu.memory_space<vmem>>, %arg3: memref<1x96xf32, #tpu.memory_space<vmem>>, %arg4: memref<8x8xf32, #tpu.memory_space<vmem>>, %arg5: memref<1x8x32xf32, #tpu.memory_space<vmem>>) attributes {dimension_semantics = [#tpu.dimension_semantics<parallel>], iteration_bounds = array<i64: 2>, scalar_prefetch = 0 : i64, scratch_operands = 0 : i64, tpu.core_type = #tpu.core_type<tc>, window_params = [{transform_indices = @transform_0, window_bounds = array<i64: 1, 8, 32>}, {pipeline_mode = #tpu.pipeline_mode<synchronous>, transform_indices = @transform_1, window_bounds = array<i64: 32, 96>}, {pipeline_mode = #tpu.pipeline_mode<synchronous>, transform_indices = @transform_2, window_bounds = array<i64: 1, 96>}, {pipeline_mode = #tpu.pipeline_mode<synchronous>, transform_indices = @transform_3, window_bounds = array<i64: 8, 8>}, {transform_indices = @transform_4, window_bounds = array<i64: 1, 8, 32>}]} {
    %c0 = arith.constant 0 : index
    %c0_0 = arith.constant 0 : index
    %c0_1 = arith.constant 0 : index
    %0 = vector.load %arg1[%c0, %c0_0, %c0_1] : memref<1x8x32xf32, #tpu.memory_space<vmem>>, vector<1x8x32xf32>
    %1 = vector.shape_cast %0 : vector<1x8x32xf32> to vector<8x32xf32>
    %c0_2 = arith.constant 0 : index
    %c0_3 = arith.constant 0 : index
    %2 = vector.load %arg2[%c0_2, %c0_3] : memref<32x96xf32, #tpu.memory_space<vmem>>, vector<32x96xf32>
    %cst = arith.constant dense<0.000000e+00> : vector<8x96xf32>
    %3 = tpu.matmul %1, %2, %cst {dimension_numbers = #tpu.dot_dimension_numbers<[1], [0], [0], [1], [0, 0, 1, 1], [], []>} : vector<8x32xf32>, vector<32x96xf32>, vector<8x96xf32> -> vector<8x96xf32>
    %c0_4 = arith.constant 0 : index
    %c0_5 = arith.constant 0 : index
    %4 = vector.load %arg3[%c0_4, %c0_5] : memref<1x96xf32, #tpu.memory_space<vmem>>, vector<1x96xf32>
    %5 = vector.broadcast %4 : vector<1x96xf32> to vector<8x96xf32>
    %6 = arith.addf %3, %5 : vector<8x96xf32>
    %7 = tpu.iota {dimensions = array<i32: 0>} : vector<8x8xi32>
    %8 = tpu.iota {dimensions = array<i32: 1>} : vector<8x8xi32>
    %9 = arith.cmpi sle, %8, %7 : vector<8x8xi32>
    %c0_6 = arith.constant 0 : index
    %c0_7 = arith.constant 0 : index
    %10 = vector.load %arg4[%c0_6, %c0_7] : memref<8x8xf32, #tpu.memory_space<vmem>>, vector<8x8xf32>
    %11 = vector.extract_strided_slice %6 {offsets = [0, 0], sizes = [8, 8], strides = [1, 1]} : vector<8x96xf32> to vector<8x8xf32>
    %12 = vector.extract_strided_slice %6 {offsets = [0, 32], sizes = [8, 8], strides = [1, 1]} : vector<8x96xf32> to vector<8x8xf32>
    %13 = tpu.transpose %12, [1, 0] : vector<8x8xf32> -> vector<8x8xf32>
    %14 = vector.extract_strided_slice %6 {offsets = [0, 64], sizes = [8, 8], strides = [1, 1]} : vector<8x96xf32> to vector<8x8xf32>
    %cst_8 = arith.constant dense<0.000000e+00> : vector<8x8xf32>
    %15 = tpu.matmul %11, %10, %cst_8 {dimension_numbers = #tpu.dot_dimension_numbers<[1], [0], [0], [1], [0, 0, 1, 1], [], []>} : vector<8x8xf32>, vector<8x8xf32>, vector<8x8xf32> -> vector<8x8xf32>
    %16 = arith.subi %8, %7 : vector<8x8xi32>
    %cst_9 = arith.constant 0.000000e+00 : f32
    %17 = vector.broadcast %cst_9 : f32 to vector<8x8xf32>
    %c-7_i32 = arith.constant -7 : i32
    %18 = vector.broadcast %c-7_i32 : i32 to vector<8x8xi32>
    %19 = arith.cmpi eq, %16, %18 : vector<8x8xi32>
    %20 = vector.extract_strided_slice %15 {offsets = [0, 0], sizes = [8, 1], strides = [1, 1]} : vector<8x8xf32> to vector<8x1xf32>
    %cst_10 = arith.constant 0.000000e+00 : f32
    %21 = vector.shape_cast %20 : vector<8x1xf32> to vector<8x1xf32>
    %22 = vector.broadcast %21 : vector<8x1xf32> to vector<8x8xf32>
    %23 = vector.broadcast %cst_10 : f32 to vector<8x8xf32>
    %24 = arith.select %19, %22, %23 : vector<8x8xi1>, vector<8x8xf32>
    %25 = arith.addf %17, %24 : vector<8x8xf32>
    %c-6_i32 = arith.constant -6 : i32
    %26 = vector.broadcast %c-6_i32 : i32 to vector<8x8xi32>
    %27 = arith.cmpi eq, %16, %26 : vector<8x8xi32>
    %28 = vector.extract_strided_slice %15 {offsets = [0, 1], sizes = [8, 1], strides = [1, 1]} : vector<8x8xf32> to vector<8x1xf32>
    %cst_11 = arith.constant 0.000000e+00 : f32
    %29 = vector.shape_cast %28 : vector<8x1xf32> to vector<8x1xf32>
    %30 = vector.broadcast %29 : vector<8x1xf32> to vector<8x8xf32>
    %31 = vector.broadcast %cst_11 : f32 to vector<8x8xf32>
    %32 = arith.select %27, %30, %31 : vector<8x8xi1>, vector<8x8xf32>
    %33 = arith.addf %25, %32 : vector<8x8xf32>
    %c-5_i32 = arith.constant -5 : i32
    %34 = vector.broadcast %c-5_i32 : i32 to vector<8x8xi32>
    %35 = arith.cmpi eq, %16, %34 : vector<8x8xi32>
    %36 = vector.extract_strided_slice %15 {offsets = [0, 2], sizes = [8, 1], strides = [1, 1]} : vector<8x8xf32> to vector<8x1xf32>
    %cst_12 = arith.constant 0.000000e+00 : f32
    %37 = vector.shape_cast %36 : vector<8x1xf32> to vector<8x1xf32>
    %38 = vector.broadcast %37 : vector<8x1xf32> to vector<8x8xf32>
    %39 = vector.broadcast %cst_12 : f32 to vector<8x8xf32>
    %40 = arith.select %35, %38, %39 : vector<8x8xi1>, vector<8x8xf32>
    %41 = arith.addf %33, %40 : vector<8x8xf32>
    %c-4_i32 = arith.constant -4 : i32
    %42 = vector.broadcast %c-4_i32 : i32 to vector<8x8xi32>
    %43 = arith.cmpi eq, %16, %42 : vector<8x8xi32>
    %44 = vector.extract_strided_slice %15 {offsets = [0, 3], sizes = [8, 1], strides = [1, 1]} : vector<8x8xf32> to vector<8x1xf32>
    %cst_13 = arith.constant 0.000000e+00 : f32
    %45 = vector.shape_cast %44 : vector<8x1xf32> to vector<8x1xf32>
    %46 = vector.broadcast %45 : vector<8x1xf32> to vector<8x8xf32>
    %47 = vector.broadcast %cst_13 : f32 to vector<8x8xf32>
    %48 = arith.select %43, %46, %47 : vector<8x8xi1>, vector<8x8xf32>
    %49 = arith.addf %41, %48 : vector<8x8xf32>
    %c-3_i32 = arith.constant -3 : i32
    %50 = vector.broadcast %c-3_i32 : i32 to vector<8x8xi32>
    %51 = arith.cmpi eq, %16, %50 : vector<8x8xi32>
    %52 = vector.extract_strided_slice %15 {offsets = [0, 4], sizes = [8, 1], strides = [1, 1]} : vector<8x8xf32> to vector<8x1xf32>
    %cst_14 = arith.constant 0.000000e+00 : f32
    %53 = vector.shape_cast %52 : vector<8x1xf32> to vector<8x1xf32>
    %54 = vector.broadcast %53 : vector<8x1xf32> to vector<8x8xf32>
    %55 = vector.broadcast %cst_14 : f32 to vector<8x8xf32>
    %56 = arith.select %51, %54, %55 : vector<8x8xi1>, vector<8x8xf32>
    %57 = arith.addf %49, %56 : vector<8x8xf32>
    %c-2_i32 = arith.constant -2 : i32
    %58 = vector.broadcast %c-2_i32 : i32 to vector<8x8xi32>
    %59 = arith.cmpi eq, %16, %58 : vector<8x8xi32>
    %60 = vector.extract_strided_slice %15 {offsets = [0, 5], sizes = [8, 1], strides = [1, 1]} : vector<8x8xf32> to vector<8x1xf32>
    %cst_15 = arith.constant 0.000000e+00 : f32
    %61 = vector.shape_cast %60 : vector<8x1xf32> to vector<8x1xf32>
    %62 = vector.broadcast %61 : vector<8x1xf32> to vector<8x8xf32>
    %63 = vector.broadcast %cst_15 : f32 to vector<8x8xf32>
    %64 = arith.select %59, %62, %63 : vector<8x8xi1>, vector<8x8xf32>
    %65 = arith.addf %57, %64 : vector<8x8xf32>
    %c-1_i32 = arith.constant -1 : i32
    %66 = vector.broadcast %c-1_i32 : i32 to vector<8x8xi32>
    %67 = arith.cmpi eq, %16, %66 : vector<8x8xi32>
    %68 = vector.extract_strided_slice %15 {offsets = [0, 6], sizes = [8, 1], strides = [1, 1]} : vector<8x8xf32> to vector<8x1xf32>
    %cst_16 = arith.constant 0.000000e+00 : f32
    %69 = vector.shape_cast %68 : vector<8x1xf32> to vector<8x1xf32>
    %70 = vector.broadcast %69 : vector<8x1xf32> to vector<8x8xf32>
    %71 = vector.broadcast %cst_16 : f32 to vector<8x8xf32>
    %72 = arith.select %67, %70, %71 : vector<8x8xi1>, vector<8x8xf32>
    %73 = arith.addf %65, %72 : vector<8x8xf32>
    %c0_i32 = arith.constant 0 : i32
    %74 = vector.broadcast %c0_i32 : i32 to vector<8x8xi32>
    %75 = arith.cmpi eq, %16, %74 : vector<8x8xi32>
    %76 = vector.extract_strided_slice %15 {offsets = [0, 7], sizes = [8, 1], strides = [1, 1]} : vector<8x8xf32> to vector<8x1xf32>
    %cst_17 = arith.constant 0.000000e+00 : f32
    %77 = vector.shape_cast %76 : vector<8x1xf32> to vector<8x1xf32>
    %78 = vector.broadcast %77 : vector<8x1xf32> to vector<8x8xf32>
    %79 = vector.broadcast %cst_17 : f32 to vector<8x8xf32>
    %80 = arith.select %75, %78, %79 : vector<8x8xi1>, vector<8x8xf32>
    %81 = arith.addf %73, %80 : vector<8x8xf32>
    %cst_18 = arith.constant dense<0.000000e+00> : vector<8x8xf32>
    %82 = tpu.matmul %11, %13, %cst_18 {dimension_numbers = #tpu.dot_dimension_numbers<[1], [0], [0], [1], [0, 0, 1, 1], [], []>} : vector<8x8xf32>, vector<8x8xf32>, vector<8x8xf32> -> vector<8x8xf32>
    %83 = arith.addf %82, %81 : vector<8x8xf32>
    %cst_19 = arith.constant 0xFF800000 : f32
    %84 = vector.broadcast %cst_19 : f32 to vector<8x8xf32>
    %85 = arith.select %9, %83, %84 : vector<8x8xi1>, vector<8x8xf32>
    %cst_20 = arith.constant dense<0xFF800000> : vector<8xf32>
    %86 = vector.multi_reduction <maximumf>, %85, %cst_20 [1] : vector<8x8xf32> to vector<8xf32>
    %87 = vector.shape_cast %86 : vector<8xf32> to vector<8x1xf32>
    %88 = vector.broadcast %87 : vector<8x1xf32> to vector<8x8xf32>
    %89 = arith.subf %85, %88 : vector<8x8xf32>
    %90 = math.exp %89 : vector<8x8xf32>
    %cst_21 = arith.constant dense<0.000000e+00> : vector<8xf32>
    %91 = vector.multi_reduction <add>, %90, %cst_21 [1] : vector<8x8xf32> to vector<8xf32>
    %92 = vector.shape_cast %91 : vector<8xf32> to vector<8x1xf32>
    %93 = vector.broadcast %92 : vector<8x1xf32> to vector<8x8xf32>
    %94 = arith.divf %90, %93 : vector<8x8xf32>
    %cst_22 = arith.constant dense<0.000000e+00> : vector<8x8xf32>
    %95 = tpu.matmul %94, %14, %cst_22 {dimension_numbers = #tpu.dot_dimension_numbers<[1], [0], [0], [1], [0, 0, 1, 1], [], []>} : vector<8x8xf32>, vector<8x8xf32>, vector<8x8xf32> -> vector<8x8xf32>
    %c0_23 = arith.constant 0 : index
    %c0_24 = arith.constant 0 : index
    %c0_25 = arith.constant 0 : index
    %96 = vector.load %arg5[%c0_23, %c0_24, %c0_25] : memref<1x8x32xf32, #tpu.memory_space<vmem>>, vector<1x8x8xf32>
    %97 = vector.shape_cast %96 : vector<1x8x8xf32> to vector<8x8xf32>
    %98 = vector.shape_cast %95 : vector<8x8xf32> to vector<1x8x8xf32>
    tpu.vector_store %arg5[%c0_23, %c0_24, %c0_25], %98 {strides = array<i32>} : memref<1x8x32xf32, #tpu.memory_space<vmem>>, vector<1x8x8xf32>,
    %99 = vector.extract_strided_slice %6 {offsets = [0, 8], sizes = [8, 8], strides = [1, 1]} : vector<8x96xf32> to vector<8x8xf32>
    %100 = vector.extract_strided_slice %6 {offsets = [0, 40], sizes = [8, 8], strides = [1, 1]} : vector<8x96xf32> to vector<8x8xf32>
    %101 = tpu.transpose %100, [1, 0] : vector<8x8xf32> -> vector<8x8xf32>
    %102 = vector.extract_strided_slice %6 {offsets = [0, 72], sizes = [8, 8], strides = [1, 1]} : vector<8x96xf32> to vector<8x8xf32>
    %cst_26 = arith.constant dense<0.000000e+00> : vector<8x8xf32>
    %103 = tpu.matmul %99, %10, %cst_26 {dimension_numbers = #tpu.dot_dimension_numbers<[1], [0], [0], [1], [0, 0, 1, 1], [], []>} : vector<8x8xf32>, vector<8x8xf32>, vector<8x8xf32> -> vector<8x8xf32>
    %104 = arith.subi %8, %7 : vector<8x8xi32>
    %cst_27 = arith.constant 0.000000e+00 : f32
    %105 = vector.broadcast %cst_27 : f32 to vector<8x8xf32>
    %c-7_i32_28 = arith.constant -7 : i32
    %106 = vector.broadcast %c-7_i32_28 : i32 to vector<8x8xi32>
    %107 = arith.cmpi eq, %104, %106 : vector<8x8xi32>
    %108 = vector.extract_strided_slice %103 {offsets = [0, 0], sizes = [8, 1], strides = [1, 1]} : vector<8x8xf32> to vector<8x1xf32>
    %cst_29 = arith.constant 0.000000e+00 : f32
    %109 = vector.shape_cast %108 : vector<8x1xf32> to vector<8x1xf32>
    %110 = vector.broadcast %109 : vector<8x1xf32> to vector<8x8xf32>
    %111 = vector.broadcast %cst_29 : f32 to vector<8x8xf32>
    %112 = arith.select %107, %110, %111 : vector<8x8xi1>, vector<8x8xf32>
    %113 = arith.addf %105, %112 : vector<8x8xf32>
    %c-6_i32_30 = arith.constant -6 : i32
    %114 = vector.broadcast %c-6_i32_30 : i32 to vector<8x8xi32>
    %115 = arith.cmpi eq, %104, %114 : vector<8x8xi32>
    %116 = vector.extract_strided_slice %103 {offsets = [0, 1], sizes = [8, 1], strides = [1, 1]} : vector<8x8xf32> to vector<8x1xf32>
    %cst_31 = arith.constant 0.000000e+00 : f32
    %117 = vector.shape_cast %116 : vector<8x1xf32> to vector<8x1xf32>
    %118 = vector.broadcast %117 : vector<8x1xf32> to vector<8x8xf32>
    %119 = vector.broadcast %cst_31 : f32 to vector<8x8xf32>
    %120 = arith.select %115, %118, %119 : vector<8x8xi1>, vector<8x8xf32>
    %121 = arith.addf %113, %120 : vector<8x8xf32>
    %c-5_i32_32 = arith.constant -5 : i32
    %122 = vector.broadcast %c-5_i32_32 : i32 to vector<8x8xi32>
    %123 = arith.cmpi eq, %104, %122 : vector<8x8xi32>
    %124 = vector.extract_strided_slice %103 {offsets = [0, 2], sizes = [8, 1], strides = [1, 1]} : vector<8x8xf32> to vector<8x1xf32>
    %cst_33 = arith.constant 0.000000e+00 : f32
    %125 = vector.shape_cast %124 : vector<8x1xf32> to vector<8x1xf32>
    %126 = vector.broadcast %125 : vector<8x1xf32> to vector<8x8xf32>
    %127 = vector.broadcast %cst_33 : f32 to vector<8x8xf32>
    %128 = arith.select %123, %126, %127 : vector<8x8xi1>, vector<8x8xf32>
    %129 = arith.addf %121, %128 : vector<8x8xf32>
    %c-4_i32_34 = arith.constant -4 : i32
    %130 = vector.broadcast %c-4_i32_34 : i32 to vector<8x8xi32>
    %131 = arith.cmpi eq, %104, %130 : vector<8x8xi32>
    %132 = vector.extract_strided_slice %103 {offsets = [0, 3], sizes = [8, 1], strides = [1, 1]} : vector<8x8xf32> to vector<8x1xf32>
    %cst_35 = arith.constant 0.000000e+00 : f32
    %133 = vector.shape_cast %132 : vector<8x1xf32> to vector<8x1xf32>
    %134 = vector.broadcast %133 : vector<8x1xf32> to vector<8x8xf32>
    %135 = vector.broadcast %cst_35 : f32 to vector<8x8xf32>
    %136 = arith.select %131, %134, %135 : vector<8x8xi1>, vector<8x8xf32>
    %137 = arith.addf %129, %136 : vector<8x8xf32>
    %c-3_i32_36 = arith.constant -3 : i32
    %138 = vector.broadcast %c-3_i32_36 : i32 to vector<8x8xi32>
    %139 = arith.cmpi eq, %104, %138 : vector<8x8xi32>
    %140 = vector.extract_strided_slice %103 {offsets = [0, 4], sizes = [8, 1], strides = [1, 1]} : vector<8x8xf32> to vector<8x1xf32>
    %cst_37 = arith.constant 0.000000e+00 : f32
    %141 = vector.shape_cast %140 : vector<8x1xf32> to vector<8x1xf32>
    %142 = vector.broadcast %141 : vector<8x1xf32> to vector<8x8xf32>
    %143 = vector.broadcast %cst_37 : f32 to vector<8x8xf32>
    %144 = arith.select %139, %142, %143 : vector<8x8xi1>, vector<8x8xf32>
    %145 = arith.addf %137, %144 : vector<8x8xf32>
    %c-2_i32_38 = arith.constant -2 : i32
    %146 = vector.broadcast %c-2_i32_38 : i32 to vector<8x8xi32>
    %147 = arith.cmpi eq, %104, %146 : vector<8x8xi32>
    %148 = vector.extract_strided_slice %103 {offsets = [0, 5], sizes = [8, 1], strides = [1, 1]} : vector<8x8xf32> to vector<8x1xf32>
    %cst_39 = arith.constant 0.000000e+00 : f32
    %149 = vector.shape_cast %148 : vector<8x1xf32> to vector<8x1xf32>
    %150 = vector.broadcast %149 : vector<8x1xf32> to vector<8x8xf32>
    %151 = vector.broadcast %cst_39 : f32 to vector<8x8xf32>
    %152 = arith.select %147, %150, %151 : vector<8x8xi1>, vector<8x8xf32>
    %153 = arith.addf %145, %152 : vector<8x8xf32>
    %c-1_i32_40 = arith.constant -1 : i32
    %154 = vector.broadcast %c-1_i32_40 : i32 to vector<8x8xi32>
    %155 = arith.cmpi eq, %104, %154 : vector<8x8xi32>
    %156 = vector.extract_strided_slice %103 {offsets = [0, 6], sizes = [8, 1], strides = [1, 1]} : vector<8x8xf32> to vector<8x1xf32>
    %cst_41 = arith.constant 0.000000e+00 : f32
    %157 = vector.shape_cast %156 : vector<8x1xf32> to vector<8x1xf32>
    %158 = vector.broadcast %157 : vector<8x1xf32> to vector<8x8xf32>
    %159 = vector.broadcast %cst_41 : f32 to vector<8x8xf32>
    %160 = arith.select %155, %158, %159 : vector<8x8xi1>, vector<8x8xf32>
    %161 = arith.addf %153, %160 : vector<8x8xf32>
    %c0_i32_42 = arith.constant 0 : i32
    %162 = vector.broadcast %c0_i32_42 : i32 to vector<8x8xi32>
    %163 = arith.cmpi eq, %104, %162 : vector<8x8xi32>
    %164 = vector.extract_strided_slice %103 {offsets = [0, 7], sizes = [8, 1], strides = [1, 1]} : vector<8x8xf32> to vector<8x1xf32>
    %cst_43 = arith.constant 0.000000e+00 : f32
    %165 = vector.shape_cast %164 : vector<8x1xf32> to vector<8x1xf32>
    %166 = vector.broadcast %165 : vector<8x1xf32> to vector<8x8xf32>
    %167 = vector.broadcast %cst_43 : f32 to vector<8x8xf32>
    %168 = arith.select %163, %166, %167 : vector<8x8xi1>, vector<8x8xf32>
    %169 = arith.addf %161, %168 : vector<8x8xf32>
    %cst_44 = arith.constant dense<0.000000e+00> : vector<8x8xf32>
    %170 = tpu.matmul %99, %101, %cst_44 {dimension_numbers = #tpu.dot_dimension_numbers<[1], [0], [0], [1], [0, 0, 1, 1], [], []>} : vector<8x8xf32>, vector<8x8xf32>, vector<8x8xf32> -> vector<8x8xf32>
    %171 = arith.addf %170, %169 : vector<8x8xf32>
    %cst_45 = arith.constant 0xFF800000 : f32
    %172 = vector.broadcast %cst_45 : f32 to vector<8x8xf32>
    %173 = arith.select %9, %171, %172 : vector<8x8xi1>, vector<8x8xf32>
    %cst_46 = arith.constant dense<0xFF800000> : vector<8xf32>
    %174 = vector.multi_reduction <maximumf>, %173, %cst_46 [1] : vector<8x8xf32> to vector<8xf32>
    %175 = vector.shape_cast %174 : vector<8xf32> to vector<8x1xf32>
    %176 = vector.broadcast %175 : vector<8x1xf32> to vector<8x8xf32>
    %177 = arith.subf %173, %176 : vector<8x8xf32>
    %178 = math.exp %177 : vector<8x8xf32>
    %cst_47 = arith.constant dense<0.000000e+00> : vector<8xf32>
    %179 = vector.multi_reduction <add>, %178, %cst_47 [1] : vector<8x8xf32> to vector<8xf32>
    %180 = vector.shape_cast %179 : vector<8xf32> to vector<8x1xf32>
    %181 = vector.broadcast %180 : vector<8x1xf32> to vector<8x8xf32>
    %182 = arith.divf %178, %181 : vector<8x8xf32>
    %cst_48 = arith.constant dense<0.000000e+00> : vector<8x8xf32>
    %183 = tpu.matmul %182, %102, %cst_48 {dimension_numbers = #tpu.dot_dimension_numbers<[1], [0], [0], [1], [0, 0, 1, 1], [], []>} : vector<8x8xf32>, vector<8x8xf32>, vector<8x8xf32> -> vector<8x8xf32>
    %c0_49 = arith.constant 0 : index
    %c0_50 = arith.constant 0 : index
    %c8 = arith.constant 8 : index
    %184 = vector.load %arg5[%c0_49, %c0_50, %c8] : memref<1x8x32xf32, #tpu.memory_space<vmem>>, vector<1x8x8xf32>
    %185 = vector.shape_cast %184 : vector<1x8x8xf32> to vector<8x8xf32>
    %186 = vector.shape_cast %183 : vector<8x8xf32> to vector<1x8x8xf32>
    tpu.vector_store %arg5[%c0_49, %c0_50, %c8], %186 {strides = array<i32>} : memref<1x8x32xf32, #tpu.memory_space<vmem>>, vector<1x8x8xf32>,
    %187 = vector.extract_strided_slice %6 {offsets = [0, 16], sizes = [8, 8], strides = [1, 1]} : vector<8x96xf32> to vector<8x8xf32>
    %188 = vector.extract_strided_slice %6 {offsets = [0, 48], sizes = [8, 8], strides = [1, 1]} : vector<8x96xf32> to vector<8x8xf32>
    %189 = tpu.transpose %188, [1, 0] : vector<8x8xf32> -> vector<8x8xf32>
    %190 = vector.extract_strided_slice %6 {offsets = [0, 80], sizes = [8, 8], strides = [1, 1]} : vector<8x96xf32> to vector<8x8xf32>
    %cst_51 = arith.constant dense<0.000000e+00> : vector<8x8xf32>
    %191 = tpu.matmul %187, %10, %cst_51 {dimension_numbers = #tpu.dot_dimension_numbers<[1], [0], [0], [1], [0, 0, 1, 1], [], []>} : vector<8x8xf32>, vector<8x8xf32>, vector<8x8xf32> -> vector<8x8xf32>
    %192 = arith.subi %8, %7 : vector<8x8xi32>
    %cst_52 = arith.constant 0.000000e+00 : f32
    %193 = vector.broadcast %cst_52 : f32 to vector<8x8xf32>
    %c-7_i32_53 = arith.constant -7 : i32
    %194 = vector.broadcast %c-7_i32_53 : i32 to vector<8x8xi32>
    %195 = arith.cmpi eq, %192, %194 : vector<8x8xi32>
    %196 = vector.extract_strided_slice %191 {offsets = [0, 0], sizes = [8, 1], strides = [1, 1]} : vector<8x8xf32> to vector<8x1xf32>
    %cst_54 = arith.constant 0.000000e+00 : f32
    %197 = vector.shape_cast %196 : vector<8x1xf32> to vector<8x1xf32>
    %198 = vector.broadcast %197 : vector<8x1xf32> to vector<8x8xf32>
    %199 = vector.broadcast %cst_54 : f32 to vector<8x8xf32>
    %200 = arith.select %195, %198, %199 : vector<8x8xi1>, vector<8x8xf32>
    %201 = arith.addf %193, %200 : vector<8x8xf32>
    %c-6_i32_55 = arith.constant -6 : i32
    %202 = vector.broadcast %c-6_i32_55 : i32 to vector<8x8xi32>
    %203 = arith.cmpi eq, %192, %202 : vector<8x8xi32>
    %204 = vector.extract_strided_slice %191 {offsets = [0, 1], sizes = [8, 1], strides = [1, 1]} : vector<8x8xf32> to vector<8x1xf32>
    %cst_56 = arith.constant 0.000000e+00 : f32
    %205 = vector.shape_cast %204 : vector<8x1xf32> to vector<8x1xf32>
    %206 = vector.broadcast %205 : vector<8x1xf32> to vector<8x8xf32>
    %207 = vector.broadcast %cst_56 : f32 to vector<8x8xf32>
    %208 = arith.select %203, %206, %207 : vector<8x8xi1>, vector<8x8xf32>
    %209 = arith.addf %201, %208 : vector<8x8xf32>
    %c-5_i32_57 = arith.constant -5 : i32
    %210 = vector.broadcast %c-5_i32_57 : i32 to vector<8x8xi32>
    %211 = arith.cmpi eq, %192, %210 : vector<8x8xi32>
    %212 = vector.extract_strided_slice %191 {offsets = [0, 2], sizes = [8, 1], strides = [1, 1]} : vector<8x8xf32> to vector<8x1xf32>
    %cst_58 = arith.constant 0.000000e+00 : f32
    %213 = vector.shape_cast %212 : vector<8x1xf32> to vector<8x1xf32>
    %214 = vector.broadcast %213 : vector<8x1xf32> to vector<8x8xf32>
    %215 = vector.broadcast %cst_58 : f32 to vector<8x8xf32>
    %216 = arith.select %211, %214, %215 : vector<8x8xi1>, vector<8x8xf32>
    %217 = arith.addf %209, %216 : vector<8x8xf32>
    %c-4_i32_59 = arith.constant -4 : i32
    %218 = vector.broadcast %c-4_i32_59 : i32 to vector<8x8xi32>
    %219 = arith.cmpi eq, %192, %218 : vector<8x8xi32>
    %220 = vector.extract_strided_slice %191 {offsets = [0, 3], sizes = [8, 1], strides = [1, 1]} : vector<8x8xf32> to vector<8x1xf32>
    %cst_60 = arith.constant 0.000000e+00 : f32
    %221 = vector.shape_cast %220 : vector<8x1xf32> to vector<8x1xf32>
    %222 = vector.broadcast %221 : vector<8x1xf32> to vector<8x8xf32>
    %223 = vector.broadcast %cst_60 : f32 to vector<8x8xf32>
    %224 = arith.select %219, %222, %223 : vector<8x8xi1>, vector<8x8xf32>
    %225 = arith.addf %217, %224 : vector<8x8xf32>
    %c-3_i32_61 = arith.constant -3 : i32
    %226 = vector.broadcast %c-3_i32_61 : i32 to vector<8x8xi32>
    %227 = arith.cmpi eq, %192, %226 : vector<8x8xi32>
    %228 = vector.extract_strided_slice %191 {offsets = [0, 4], sizes = [8, 1], strides = [1, 1]} : vector<8x8xf32> to vector<8x1xf32>
    %cst_62 = arith.constant 0.000000e+00 : f32
    %229 = vector.shape_cast %228 : vector<8x1xf32> to vector<8x1xf32>
    %230 = vector.broadcast %229 : vector<8x1xf32> to vector<8x8xf32>
    %231 = vector.broadcast %cst_62 : f32 to vector<8x8xf32>
    %232 = arith.select %227, %230, %231 : vector<8x8xi1>, vector<8x8xf32>
    %233 = arith.addf %225, %232 : vector<8x8xf32>
    %c-2_i32_63 = arith.constant -2 : i32
    %234 = vector.broadcast %c-2_i32_63 : i32 to vector<8x8xi32>
    %235 = arith.cmpi eq, %192, %234 : vector<8x8xi32>
    %236 = vector.extract_strided_slice %191 {offsets = [0, 5], sizes = [8, 1], strides = [1, 1]} : vector<8x8xf32> to vector<8x1xf32>
    %cst_64 = arith.constant 0.000000e+00 : f32
    %237 = vector.shape_cast %236 : vector<8x1xf32> to vector<8x1xf32>
    %238 = vector.broadcast %237 : vector<8x1xf32> to vector<8x8xf32>
    %239 = vector.broadcast %cst_64 : f32 to vector<8x8xf32>
    %240 = arith.select %235, %238, %239 : vector<8x8xi1>, vector<8x8xf32>
    %241 = arith.addf %233, %240 : vector<8x8xf32>
    %c-1_i32_65 = arith.constant -1 : i32
    %242 = vector.broadcast %c-1_i32_65 : i32 to vector<8x8xi32>
    %243 = arith.cmpi eq, %192, %242 : vector<8x8xi32>
    %244 = vector.extract_strided_slice %191 {offsets = [0, 6], sizes = [8, 1], strides = [1, 1]} : vector<8x8xf32> to vector<8x1xf32>
    %cst_66 = arith.constant 0.000000e+00 : f32
    %245 = vector.shape_cast %244 : vector<8x1xf32> to vector<8x1xf32>
    %246 = vector.broadcast %245 : vector<8x1xf32> to vector<8x8xf32>
    %247 = vector.broadcast %cst_66 : f32 to vector<8x8xf32>
    %248 = arith.select %243, %246, %247 : vector<8x8xi1>, vector<8x8xf32>
    %249 = arith.addf %241, %248 : vector<8x8xf32>
    %c0_i32_67 = arith.constant 0 : i32
    %250 = vector.broadcast %c0_i32_67 : i32 to vector<8x8xi32>
    %251 = arith.cmpi eq, %192, %250 : vector<8x8xi32>
    %252 = vector.extract_strided_slice %191 {offsets = [0, 7], sizes = [8, 1], strides = [1, 1]} : vector<8x8xf32> to vector<8x1xf32>
    %cst_68 = arith.constant 0.000000e+00 : f32
    %253 = vector.shape_cast %252 : vector<8x1xf32> to vector<8x1xf32>
    %254 = vector.broadcast %253 : vector<8x1xf32> to vector<8x8xf32>
    %255 = vector.broadcast %cst_68 : f32 to vector<8x8xf32>
    %256 = arith.select %251, %254, %255 : vector<8x8xi1>, vector<8x8xf32>
    %257 = arith.addf %249, %256 : vector<8x8xf32>
    %cst_69 = arith.constant dense<0.000000e+00> : vector<8x8xf32>
    %258 = tpu.matmul %187, %189, %cst_69 {dimension_numbers = #tpu.dot_dimension_numbers<[1], [0], [0], [1], [0, 0, 1, 1], [], []>} : vector<8x8xf32>, vector<8x8xf32>, vector<8x8xf32> -> vector<8x8xf32>
    %259 = arith.addf %258, %257 : vector<8x8xf32>
    %cst_70 = arith.constant 0xFF800000 : f32
    %260 = vector.broadcast %cst_70 : f32 to vector<8x8xf32>
    %261 = arith.select %9, %259, %260 : vector<8x8xi1>, vector<8x8xf32>
    %cst_71 = arith.constant dense<0xFF800000> : vector<8xf32>
    %262 = vector.multi_reduction <maximumf>, %261, %cst_71 [1] : vector<8x8xf32> to vector<8xf32>
    %263 = vector.shape_cast %262 : vector<8xf32> to vector<8x1xf32>
    %264 = vector.broadcast %263 : vector<8x1xf32> to vector<8x8xf32>
    %265 = arith.subf %261, %264 : vector<8x8xf32>
    %266 = math.exp %265 : vector<8x8xf32>
    %cst_72 = arith.constant dense<0.000000e+00> : vector<8xf32>
    %267 = vector.multi_reduction <add>, %266, %cst_72 [1] : vector<8x8xf32> to vector<8xf32>
    %268 = vector.shape_cast %267 : vector<8xf32> to vector<8x1xf32>
    %269 = vector.broadcast %268 : vector<8x1xf32> to vector<8x8xf32>
    %270 = arith.divf %266, %269 : vector<8x8xf32>
    %cst_73 = arith.constant dense<0.000000e+00> : vector<8x8xf32>
    %271 = tpu.matmul %270, %190, %cst_73 {dimension_numbers = #tpu.dot_dimension_numbers<[1], [0], [0], [1], [0, 0, 1, 1], [], []>} : vector<8x8xf32>, vector<8x8xf32>, vector<8x8xf32> -> vector<8x8xf32>
    %c0_74 = arith.constant 0 : index
    %c0_75 = arith.constant 0 : index
    %c16 = arith.constant 16 : index
    %272 = vector.load %arg5[%c0_74, %c0_75, %c16] : memref<1x8x32xf32, #tpu.memory_space<vmem>>, vector<1x8x8xf32>
    %273 = vector.shape_cast %272 : vector<1x8x8xf32> to vector<8x8xf32>
    %274 = vector.shape_cast %271 : vector<8x8xf32> to vector<1x8x8xf32>
    tpu.vector_store %arg5[%c0_74, %c0_75, %c16], %274 {strides = array<i32>} : memref<1x8x32xf32, #tpu.memory_space<vmem>>, vector<1x8x8xf32>,
    %275 = vector.extract_strided_slice %6 {offsets = [0, 24], sizes = [8, 8], strides = [1, 1]} : vector<8x96xf32> to vector<8x8xf32>
    %276 = vector.extract_strided_slice %6 {offsets = [0, 56], sizes = [8, 8], strides = [1, 1]} : vector<8x96xf32> to vector<8x8xf32>
    %277 = tpu.transpose %276, [1, 0] : vector<8x8xf32> -> vector<8x8xf32>
    %278 = vector.extract_strided_slice %6 {offsets = [0, 88], sizes = [8, 8], strides = [1, 1]} : vector<8x96xf32> to vector<8x8xf32>
    %cst_76 = arith.constant dense<0.000000e+00> : vector<8x8xf32>
    %279 = tpu.matmul %275, %10, %cst_76 {dimension_numbers = #tpu.dot_dimension_numbers<[1], [0], [0], [1], [0, 0, 1, 1], [], []>} : vector<8x8xf32>, vector<8x8xf32>, vector<8x8xf32> -> vector<8x8xf32>
    %280 = arith.subi %8, %7 : vector<8x8xi32>
    %cst_77 = arith.constant 0.000000e+00 : f32
    %281 = vector.broadcast %cst_77 : f32 to vector<8x8xf32>
    %c-7_i32_78 = arith.constant -7 : i32
    %282 = vector.broadcast %c-7_i32_78 : i32 to vector<8x8xi32>
    %283 = arith.cmpi eq, %280, %282 : vector<8x8xi32>
    %284 = vector.extract_strided_slice %279 {offsets = [0, 0], sizes = [8, 1], strides = [1, 1]} : vector<8x8xf32> to vector<8x1xf32>
    %cst_79 = arith.constant 0.000000e+00 : f32
    %285 = vector.shape_cast %284 : vector<8x1xf32> to vector<8x1xf32>
    %286 = vector.broadcast %285 : vector<8x1xf32> to vector<8x8xf32>
    %287 = vector.broadcast %cst_79 : f32 to vector<8x8xf32>
    %288 = arith.select %283, %286, %287 : vector<8x8xi1>, vector<8x8xf32>
    %289 = arith.addf %281, %288 : vector<8x8xf32>
    %c-6_i32_80 = arith.constant -6 : i32
    %290 = vector.broadcast %c-6_i32_80 : i32 to vector<8x8xi32>
    %291 = arith.cmpi eq, %280, %290 : vector<8x8xi32>
    %292 = vector.extract_strided_slice %279 {offsets = [0, 1], sizes = [8, 1], strides = [1, 1]} : vector<8x8xf32> to vector<8x1xf32>
    %cst_81 = arith.constant 0.000000e+00 : f32
    %293 = vector.shape_cast %292 : vector<8x1xf32> to vector<8x1xf32>
    %294 = vector.broadcast %293 : vector<8x1xf32> to vector<8x8xf32>
    %295 = vector.broadcast %cst_81 : f32 to vector<8x8xf32>
    %296 = arith.select %291, %294, %295 : vector<8x8xi1>, vector<8x8xf32>
    %297 = arith.addf %289, %296 : vector<8x8xf32>
    %c-5_i32_82 = arith.constant -5 : i32
    %298 = vector.broadcast %c-5_i32_82 : i32 to vector<8x8xi32>
    %299 = arith.cmpi eq, %280, %298 : vector<8x8xi32>
    %300 = vector.extract_strided_slice %279 {offsets = [0, 2], sizes = [8, 1], strides = [1, 1]} : vector<8x8xf32> to vector<8x1xf32>
    %cst_83 = arith.constant 0.000000e+00 : f32
    %301 = vector.shape_cast %300 : vector<8x1xf32> to vector<8x1xf32>
    %302 = vector.broadcast %301 : vector<8x1xf32> to vector<8x8xf32>
    %303 = vector.broadcast %cst_83 : f32 to vector<8x8xf32>
    %304 = arith.select %299, %302, %303 : vector<8x8xi1>, vector<8x8xf32>
    %305 = arith.addf %297, %304 : vector<8x8xf32>
    %c-4_i32_84 = arith.constant -4 : i32
    %306 = vector.broadcast %c-4_i32_84 : i32 to vector<8x8xi32>
    %307 = arith.cmpi eq, %280, %306 : vector<8x8xi32>
    %308 = vector.extract_strided_slice %279 {offsets = [0, 3], sizes = [8, 1], strides = [1, 1]} : vector<8x8xf32> to vector<8x1xf32>
    %cst_85 = arith.constant 0.000000e+00 : f32
    %309 = vector.shape_cast %308 : vector<8x1xf32> to vector<8x1xf32>
    %310 = vector.broadcast %309 : vector<8x1xf32> to vector<8x8xf32>
    %311 = vector.broadcast %cst_85 : f32 to vector<8x8xf32>
    %312 = arith.select %307, %310, %311 : vector<8x8xi1>, vector<8x8xf32>
    %313 = arith.addf %305, %312 : vector<8x8xf32>
    %c-3_i32_86 = arith.constant -3 : i32
    %314 = vector.broadcast %c-3_i32_86 : i32 to vector<8x8xi32>
    %315 = arith.cmpi eq, %280, %314 : vector<8x8xi32>
    %316 = vector.extract_strided_slice %279 {offsets = [0, 4], sizes = [8, 1], strides = [1, 1]} : vector<8x8xf32> to vector<8x1xf32>
    %cst_87 = arith.constant 0.000000e+00 : f32
    %317 = vector.shape_cast %316 : vector<8x1xf32> to vector<8x1xf32>
    %318 = vector.broadcast %317 : vector<8x1xf32> to vector<8x8xf32>
    %319 = vector.broadcast %cst_87 : f32 to vector<8x8xf32>
    %320 = arith.select %315, %318, %319 : vector<8x8xi1>, vector<8x8xf32>
    %321 = arith.addf %313, %320 : vector<8x8xf32>
    %c-2_i32_88 = arith.constant -2 : i32
    %322 = vector.broadcast %c-2_i32_88 : i32 to vector<8x8xi32>
    %323 = arith.cmpi eq, %280, %322 : vector<8x8xi32>
    %324 = vector.extract_strided_slice %279 {offsets = [0, 5], sizes = [8, 1], strides = [1, 1]} : vector<8x8xf32> to vector<8x1xf32>
    %cst_89 = arith.constant 0.000000e+00 : f32
    %325 = vector.shape_cast %324 : vector<8x1xf32> to vector<8x1xf32>
    %326 = vector.broadcast %325 : vector<8x1xf32> to vector<8x8xf32>
    %327 = vector.broadcast %cst_89 : f32 to vector<8x8xf32>
    %328 = arith.select %323, %326, %327 : vector<8x8xi1>, vector<8x8xf32>
    %329 = arith.addf %321, %328 : vector<8x8xf32>
    %c-1_i32_90 = arith.constant -1 : i32
    %330 = vector.broadcast %c-1_i32_90 : i32 to vector<8x8xi32>
    %331 = arith.cmpi eq, %280, %330 : vector<8x8xi32>
    %332 = vector.extract_strided_slice %279 {offsets = [0, 6], sizes = [8, 1], strides = [1, 1]} : vector<8x8xf32> to vector<8x1xf32>
    %cst_91 = arith.constant 0.000000e+00 : f32
    %333 = vector.shape_cast %332 : vector<8x1xf32> to vector<8x1xf32>
    %334 = vector.broadcast %333 : vector<8x1xf32> to vector<8x8xf32>
    %335 = vector.broadcast %cst_91 : f32 to vector<8x8xf32>
    %336 = arith.select %331, %334, %335 : vector<8x8xi1>, vector<8x8xf32>
    %337 = arith.addf %329, %336 : vector<8x8xf32>
    %c0_i32_92 = arith.constant 0 : i32
    %338 = vector.broadcast %c0_i32_92 : i32 to vector<8x8xi32>
    %339 = arith.cmpi eq, %280, %338 : vector<8x8xi32>
    %340 = vector.extract_strided_slice %279 {offsets = [0, 7], sizes = [8, 1], strides = [1, 1]} : vector<8x8xf32> to vector<8x1xf32>
    %cst_93 = arith.constant 0.000000e+00 : f32
    %341 = vector.shape_cast %340 : vector<8x1xf32> to vector<8x1xf32>
    %342 = vector.broadcast %341 : vector<8x1xf32> to vector<8x8xf32>
    %343 = vector.broadcast %cst_93 : f32 to vector<8x8xf32>
    %344 = arith.select %339, %342, %343 : vector<8x8xi1>, vector<8x8xf32>
    %345 = arith.addf %337, %344 : vector<8x8xf32>
    %cst_94 = arith.constant dense<0.000000e+00> : vector<8x8xf32>
    %346 = tpu.matmul %275, %277, %cst_94 {dimension_numbers = #tpu.dot_dimension_numbers<[1], [0], [0], [1], [0, 0, 1, 1], [], []>} : vector<8x8xf32>, vector<8x8xf32>, vector<8x8xf32> -> vector<8x8xf32>
    %347 = arith.addf %346, %345 : vector<8x8xf32>
    %cst_95 = arith.constant 0xFF800000 : f32
    %348 = vector.broadcast %cst_95 : f32 to vector<8x8xf32>
    %349 = arith.select %9, %347, %348 : vector<8x8xi1>, vector<8x8xf32>
    %cst_96 = arith.constant dense<0xFF800000> : vector<8xf32>
    %350 = vector.multi_reduction <maximumf>, %349, %cst_96 [1] : vector<8x8xf32> to vector<8xf32>
    %351 = vector.shape_cast %350 : vector<8xf32> to vector<8x1xf32>
    %352 = vector.broadcast %351 : vector<8x1xf32> to vector<8x8xf32>
    %353 = arith.subf %349, %352 : vector<8x8xf32>
    %354 = math.exp %353 : vector<8x8xf32>
    %cst_97 = arith.constant dense<0.000000e+00> : vector<8xf32>
    %355 = vector.multi_reduction <add>, %354, %cst_97 [1] : vector<8x8xf32> to vector<8xf32>
    %356 = vector.shape_cast %355 : vector<8xf32> to vector<8x1xf32>
    %357 = vector.broadcast %356 : vector<8x1xf32> to vector<8x8xf32>
    %358 = arith.divf %354, %357 : vector<8x8xf32>
    %cst_98 = arith.constant dense<0.000000e+00> : vector<8x8xf32>
    %359 = tpu.matmul %358, %278, %cst_98 {dimension_numbers = #tpu.dot_dimension_numbers<[1], [0], [0], [1], [0, 0, 1, 1], [], []>} : vector<8x8xf32>, vector<8x8xf32>, vector<8x8xf32> -> vector<8x8xf32>
    %c0_99 = arith.constant 0 : index
    %c0_100 = arith.constant 0 : index
    %c24 = arith.constant 24 : index
    %360 = vector.load %arg5[%c0_99, %c0_100, %c24] : memref<1x8x32xf32, #tpu.memory_space<vmem>>, vector<1x8x8xf32>
    %361 = vector.shape_cast %360 : vector<1x8x8xf32> to vector<8x8xf32>
    %362 = vector.shape_cast %359 : vector<8x8xf32> to vector<1x8x8xf32>
    tpu.vector_store %arg5[%c0_99, %c0_100, %c24], %362 {strides = array<i32>} : memref<1x8x32xf32, #tpu.memory_space<vmem>>, vector<1x8x8xf32>,
    return
  }
  func.func @transform_0(%arg0: i32) -> (i32, i32, i32) {
    %c0_i32 = arith.constant 0 : i32
    %c0_i32_0 = arith.constant 0 : i32
    %c0_i32_1 = arith.constant 0 : i32
    return %arg0, %c0_i32, %c0_i32_0 : i32, i32, i32
  }
  func.func @transform_1(%arg0: i32) -> (i32, i32) {
    %c0_i32 = arith.constant 0 : i32
    %c0_i32_0 = arith.constant 0 : i32
    %c0_i32_1 = arith.constant 0 : i32
    return %c0_i32, %c0_i32_0 : i32, i32
  }
  func.func @transform_2(%arg0: i32) -> (i32, i32) {
    %c0_i32 = arith.constant 0 : i32
    %c0_i32_0 = arith.constant 0 : i32
    %c0_i32_1 = arith.constant 0 : i32
    return %c0_i32, %c0_i32_0 : i32, i32
  }
  func.func @transform_3(%arg0: i32) -> (i32, i32) {
    %c0_i32 = arith.constant 0 : i32
    %c0_i32_0 = arith.constant 0 : i32
    %c0_i32_1 = arith.constant 0 : i32
    return %c0_i32, %c0_i32_0 : i32, i32
  }
  func.func @transform_4(%arg0: i32) -> (i32, i32, i32) {
    %c0_i32 = arith.constant 0 : i32
    %c0_i32_0 = arith.constant 0 : i32
    %c0_i32_1 = arith.constant 0 : i32
    return %arg0, %c0_i32, %c0_i32_0 : i32, i32, i32
  }
}

</mosaic_0001>

<bundles_post_ra>
// kernel: tpu_custom_call.1
= control target key start
LH: loop header
LB: loop body
LE: loop exit
PB: predicated region body
PF: predicated region fallthrough
CT: control target
= control target key end

     0   :  { %9 = vsyncpa [#allocation3], 0  ;;  %s2143_s0 = inlined_call_operand.hbm [shape: f32[2,8,32], index: 0, kind: input, shape index: {}]   ;;  %s2144_s1 = inlined_call_operand.hbm [shape: f32[32,96], index: 1, kind: input, shape index: {}]   ;;  %s2145_s2 = inlined_call_operand.vmem [shape: f32[1,96], index: 2, kind: input, shape index: {}]   ;;  %s2146_s3 = inlined_call_operand.hbm [shape: f32[8,8], index: 3, kind: input, shape index: {}]   ;;  %s2147_s4 = inlined_call_operand.hbm [shape: f32[2,8,32], index: 4, kind: output, shape index: {}]  }
   0x1   :  { %11 = vsyncpa [#allocation3 + $0x1], 0 }
   0x2   :  { %12 = vsyncpa [#allocation6], 0 }
   0x3   :  { %13 = vsyncpa [#allocation4], 0 }
   0x4   :  { %15 = vsyncpa [#allocation4 + $0x1], 0  ;;  %s1850_s15 = smov 0   ;;  %s1852_s16 = smov 0  }
   0x5   :  { %s1854_s17 = smov 0   ;;  %s1856_s18 = smov 0  }
   0x6 LB: > { %s1871_s19 = sadd.s32 4294967295, %s1801_s18   ;;  %s1416_s20 = sadd.s32 4294967294, %s1801_s18   ;;  %s1801_s18 = sphi %s1856_s18, %s2169_s18   ;;  %s1797_s17 = sphi %s1854_s17, %s2168_s17   ;;  %s1793_s16 = sphi %s1852_s16, %s2167_s16   ;;  %s1789_s15 = sphi %s1850_s15, %s2166_s15  }
   0x7   : > { %p41_p0 = scmp.ne.s32.totalorder %s1793_s16, %s1789_s15  ;;  %p2148_p1 = scmp.eq.s32.totalorder %s1871_s19, 0 }
   0x8   : > { %p134_p3 = scmp.eq.s32.totalorder %s1416_s20, 1  ;;  %p1417_p5 = scmp.ge.s32.totalorder %s1801_s18, 1 }
   0x9   : > { %p1880_p4 = por %p2148_p1, %p41_p0  ;;  %p141_p7 = scmp.lt.s32.totalorder %s1801_s18, 3 }
   0xa   : > { %p1885_p6 = por %p134_p3, %p41_p0  ;;  %s1803_s24 = smov [#allocation5]  }
   0xb   : > { %s2152_s21 = scalar_select %p1880_p4, 1, 0 }
   0xc   : > { %s2153_s22 = scalar_select %p1885_p6, 1, 0 }
   0xd   : > { %p1890_p8 = pnand %p1417_p5, %p141_p7  ;;  %s153_s25 = sshll.u32 %s1803_s24, 4  ;;  %s154_s25 = int_to_ptr.vmem [resolvable:$true] %s153_s25 }
   0xe   : > { %s1804_s27 = smov [#allocation7]   ;;  %s1664_s29 = scalar_lea.vmem %s154_s25, 512 }
   0xf   : > { %s2154_s23 = scalar_select %p1890_p8, 1, 0 }
  0x10   : > { %p1562_p9 = pneg %p1890_p8  ;;  %s170_s28 = sshll.u32 %s1804_s27, 4  ;;  %s171_s28 = int_to_ptr.vmem [resolvable:$true] %s170_s28 }
  0x11   : > { %p1665_p13 = scmp.ne.s32.totalorder %s154_s25, %s1664_s29  ;;  %p1672_p5 = scmp.lt.s32.totalorder %s154_s25, %s154_s25 }
  0x12   : > { %p1899_p11 = pnand %p1562_p9, %p2148_p1  ;;  %p1673_p7 = scmp.lt.s32.totalorder %s1664_s29, %s1664_s29 }
  0x14   : > { %p1655_p12 = pneg %p1899_p11  ;;  %p1674_p10 = por %p1673_p7, %p1672_p5 }
  0x16   : > { %p1667_p0 = pnand %p1665_p13, %p1655_p12 }
  0x18   : > { %p1668_p3 = pneg %p1667_p0 }
  0x1a   : > { %p1675_p9 = pnand %p1674_p10, %p1668_p3 }
  0x1c   : > { %1678 = shalt.err (!%p1675_p9)
}
  0x1d   : > { %s1805_s30 = smov 128   ;;  %s1806_s5 = smov 8  }
  0x1e   : > { %1565 = dma.hbm_to_vmem [thread:$0]  (!%p1899_p11), %s2144_s1, 512, %s154_s25, [#allocation6], %s1805_s30, %s1805_s30, %s1806_s5  }
  0x1f   : > { %s1690_s8 = scalar_lea.vmem %s171_s28, 128  ;;  %p1698_p2 = scmp.lt.s32.totalorder %s171_s28, %s171_s28 }
  0x20   : > { %p1691_p1 = scmp.ne.s32.totalorder %s171_s28, %s1690_s8  ;;  %p1699_p6 = scmp.lt.s32.totalorder %s1690_s8, %s1690_s8 }
  0x22   : > { %p1693_p13 = pnand %p1691_p1, %p1655_p12  ;;  %p1700_p5 = por %p1699_p6, %p1698_p2 }
  0x24   : > { %p1694_p0 = pneg %p1693_p13 }
  0x26   : > { %p1701_p10 = pnand %p1700_p5, %p1694_p0 }
  0x28   : > { %1704 = shalt.err (!%p1701_p10)
}
  0x29   : > { %1568 = dma.hbm_to_vmem [thread:$0]  (!%p1899_p11), %s2146_s3, 128, %s171_s28, [#allocation6]  }
  0x2a   : > { %s1922_s11 = sadd.s32 1, %s1801_s18   ;;  %s28_s12 = sadd.s32 1, %s1797_s17 }
  0x2b   : > { %s25_s13 = ssub.s32 %s1801_s18, %s1922_s11  ;;  %p35_p1 = scmp.ne.s32.totalorder %s1797_s17, %s1793_s16 }
  0x2c   : > { %p26_p2 = scmp.eq.s32.totalorder %s25_s13, 0  ;;  %p36_p6 = scmp.eq.s32.totalorder %s1801_s18, 0 }
  0x2d   : > { %p2156_p12 = scmp.eq.s32.totalorder %s1871_s19, 1  ;;  %p1579_p7 = scmp.lt.s32.totalorder %s1801_s18, 2 }
  0x2e   : > { %s1938_s20 = scalar_select %p26_p2, %s1797_s17, %s28_s12  }
  0x2f   : > { %p1932_p3 = por %p2156_p12, %p35_p1  ;;  %p37_p9 = por %p36_p6, %p35_p1 }
  0x30   : > { %s181_s24 = sand.u32 1, %s1797_s17   ;;  %s1422_s26 = sshll.u32 %s1801_s18, 7 }
  0x31   : > { %s2157_s14 = scalar_select %p1932_p3, 1, 0 }
  0x32   : > { %s1421_s25 = sshll.u32 %s181_s24, 3  ;;  %s1945_s29 = scalar_lea.hbm %s2143_s0, %s1422_s26 }
  0x33   : > { %s185_s30 = scalar_lea.vmem [#allocation2], %s1421_s25  ;;  %p1947_p11 = pnand %p1579_p7, %p37_p9 }
  0x34   : > { %s192_s5 = sshll.u32 %s185_s30, 4  ;;  %s182_s7 = scalar_lea.sflag [#allocation3], %s181_s24  ;;  %s193_s5 = int_to_ptr.vmem [resolvable:$true] %s192_s5 }
  0x35   : > { %s1705_s8 = scalar_lea.hbm %s1945_s29, 128  ;;  %p1707_p0 = pneg %p1947_p11 }
  0x36   : > { %p1706_p13 = scmp.ne.s32.totalorder %s1945_s29, %s1705_s8  ;;  %s1710_s12 = scalar_lea.hbm %s2143_s0, 256 }
  0x37   : > { %p1711_p1 = scmp.lt.s32.totalorder %s1945_s29, %s2143_s0  ;;  %p1712_p2 = scmp.lt.s32.totalorder %s1710_s12, %s1705_s8 }
  0x38   : > { %p1708_p5 = pnand %p1707_p0, %p1706_p13 }
  0x39   : > { %p1713_p6 = por %p1712_p2, %p1711_p1 }
  0x3a   : > { %p1709_p10 = pneg %p1708_p5 }
  0x3c   : > { %p1714_p12 = pnand %p1713_p6, %p1709_p10 }
  0x3e   : > { %1717 = shalt.err (!%p1714_p12)
}
  0x3f   : > { %s1718_s26 = scalar_lea.vmem %s193_s5, 128  ;;  %s1807_s24 = smov [#allocation2]  }
  0x40   : > { %p1719_p7 = scmp.ne.s32.totalorder %s193_s5, %s1718_s26  ;;  %s1723_s27 = sshll.u32 %s1807_s24, 4  ;;  %s1724_s27 = int_to_ptr.vmem [resolvable:$false] %s1723_s27 }
  0x41   : > { %s1725_s28 = scalar_lea.vmem %s1724_s27, 256  ;;  %p1726_p13 = scmp.lt.s32.totalorder %s193_s5, %s1724_s27 }
  0x42   : > { %p1721_p9 = pnand %p1719_p7, %p1707_p0  ;;  %p1727_p5 = scmp.lt.s32.totalorder %s1725_s28, %s1718_s26 }
  0x44   : > { %p1722_p3 = pneg %p1721_p9  ;;  %p1728_p4 = por %p1727_p5, %p1726_p13 }
  0x46   : > { %p1729_p8 = pnand %p1728_p4, %p1722_p3 }
  0x48   : > { %1732 = shalt.err (!%p1729_p8)
}
  0x49   : > { %1572 = dma.hbm_to_vmem [thread:$0]  (!%p1947_p11), %s1945_s29, 128, %s193_s5, %s182_s7  }
  0x4a   : > { %p2159_p10 = scmp.ne.s32.totalorder %s2154_s23, 0 }
  0x4b   : > { %s1968_s30 = sand.u32 (!%p2159_p10), 1, %s1793_s16   ;;  %p2160_p4 = scmp.ne.s32.totalorder (!%p2159_p10), %s2152_s21, 0 }
  0x4c   : > { %201 = sbr.rel (%p2159_p10) target bundleno = 2779 (0xadb), region = 36  ;;  %s1424_s8 = sshll.u32 (!%p2159_p10), %s1968_s30, 3 }
  0x4d   : > { %s204_s9 = scalar_lea.sflag (!%p2159_p10), [#allocation3], %s1968_s30  ;;  %s207_s10 = scalar_lea.vmem (!%p2159_p10), [#allocation2], %s1424_s8 }
  0x51   : > { %1776 = dma.done.wait (%p2160_p4), %s204_s9, 128  }
  0x52   : > { %1778 = vsyncadd (%p2160_p4), %s204_s9, 4294967168  ;;  %p2161_p8 = scmp.eq.s32.totalorder %s1871_s19, 0 }
  0x54   : > { %1780 = dma.done.wait (%p2161_p8), [#allocation6], 640   ;;  %p2162_p3 = pmov %p2161_p8 }
  0x55   : > { %v1808_v0 = vmov 0.0   ;;  %vm1809_vm0 = vmmov 0   ;;  %v244_v1 = vld [vmem:[#allocation5 + $0x18] sm:$0xff]  ;;  %v243_v2 = vld [vmem:[#allocation5 + $0x10] sm:$0xff]  ;;  %v242_v3 = vld [vmem:[#allocation5 + $0x8] sm:$0xff]  ;;  %vm252_vm1 = vcmask 261120   ;;  %v326_v7 = vlaneseq }
  0x56   : > { %1782 = vsyncadd (%p2162_p3), [#allocation6], 4294966656  ;;  %1479 = vmatprep.subr.mxu0 %v1808_v0  ;;  %1487 = vmatprep.mubr.msk.f32.mxu0 %vm1809_vm0, %v1808_v0  ;;  %v241_v4 = vld [vmem:[#allocation5] sm:$0xff]  ;;  %v240_v5 = vld [vmem:[%s207_s10] sm:$0xff]  ;;  %vm332_vm2 = vcmask 64512   ;;  %s1810_s29 = smov 96  }
  0x57   : > { %1490 = vmatprep.subr.mxu1 %v1808_v0  ;;  %1492 = vmatprep.mubr.msk.f32.mxu1 %vm1809_vm0, %v1808_v0  ;;  %v1994_v6 = vld [vmem:[#allocation7] sm:$0xff]  ;;  %v2000_v8 = vshrl.u32 %v326_v7, 7  ;;  %v2002_v9 = vand.u32 127, %v326_v7  ;;  %v1428_v11 = vld [vmem:[%s2145_s2] ss:$0 sm:$0xff]  ;;  %s1811_s5 = smov 120  }
  0x58   : > { %1480 = vmatpush3.msra.mxu0 %v244_v1  ;;  %1491 = vmatpush3.msra.mxu1 %v1994_v6  ;;  %s1812_s6 = smov 64   ;;  %s1813_s7 = smov 88   ;;  %vm821_vm6 = vcmask 130112   ;;  %vm1066_vm7 = vcmask 195712   ;;  %vm1311_vm8 = vcmask 261312  }
  0x59   : > { %1481 = vmatprep.subr.mxu0 %v1808_v0  ;;  %1495 = vmatprep.subr.mxu1 %v1808_v0  ;;  %v406_v10 = vsub.s32 %v2002_v9, %v2000_v8  ;;  %vm330_vm5 = vcmp.le.s32.totalorder %v2002_v9, %v2000_v8  ;;  %s1814_s12 = smov 112   ;;  %s2052_s13 = scalar_lea.vmem [#allocation8], %s1424_s8 }
  0x5a   : > { %1482 = vmatpush3.msra.mxu0 %v243_v2  ;;  %s1815_s25 = smov 56   ;;  %s1816_s26 = smov 80  }
  0x5b   : > { %1483 = vmatprep.subr.mxu0 %v1808_v0  ;;  %v407_v12 = vadd.s32 7, %v406_v10  ;;  %s1817_s24 = smov 104   ;;  %s1818_s27 = smov 48  }
  0x5c   : > { %1484 = vmatpush3.msra.mxu0 %v242_v3  ;;  %s1819_s28 = smov 72   ;;  %s1820_s8 = smov 40  }
  0x5d   : > { %1485 = vmatprep.subr.mxu0 %v1808_v0  ;;  %vm408_vm3 = vcmp.gt.s32.totalorder %v407_v12, 0  ;;  %s1821_s9 = smov 16   ;;  %s1822_s10 = smov 8  }
  0x5e   : > { %1486 = vmatpush3.msra.mxu0 %v241_v4  ;;  %v409_v16 = vsel %vm408_vm3, %v407_v12, 0  ;;  %s1823_s21 = smov 24   ;;  %s1447_s23 = sshll.u32 %s1871_s19, 7 }
  0x5f   : > { %1488 = vmatmul.mubr.msk.f32.vlgmr.msra.gmra.mxu0 %vm252_vm1, %v240_v5  ;;  %1505 = vmatprep.subr.mxu0 %v1808_v0  ;;  %vm410_vm4 = vcmp.lt.s32.totalorder %v409_v16, 7  ;;  %p2163_p0 = scmp.ne.s32.totalorder %s2157_s14, 0 }
  0x60   : > { %1507 = vmatprep.mubr.msk.f32.mxu0 %vm1809_vm0, %v1808_v0  ;;  %1506 = vmatpush3.msra.mxu0 %v1994_v6  ;;  %v411_v17 = vsel %vm410_vm4, %v409_v16, 7 }
  0x61   : > { %1515 = vmatprep.subr.mxu0 %v1808_v0  ;;  %1635 = vset.pattern.permute.xlu0 %v411_v17 }
  0x62   : > { %1636 = vset.pattern.permute.xlu1 %v411_v17 }
 0x11f   : > { %v322_v13 = vpop.f32.mrf.mxu0 }
 0x120   : > { %v2009_v14 = vadd.f32 %v1428_v11, %v322_v13 }
 0x121   : > { %v1489_v15 = vpop.f32.mrf.mxu0 }
 0x122   : > { %415 = vrot.lane.b32.xlu0 %v2009_v14, %s1810_s29  ;;  %1493 = vmatmul.mubr.msk.f32.vlgmr.msra.gmra.mxu1 %vm332_vm2, %v2009_v14  ;;  %s1327_s29 = sshll.u32 %s2052_s13, 4  ;;  %s1328_s29 = int_to_ptr.vmem [resolvable:$true] %s1327_s29 }
 0x123   : > { %1497 = vmatprep.mubr.msk.f32.mxu1 %vm1809_vm0, %v1808_v0 }
 0x194   : > { %v416_v18 = vpop.permute.xlu0 %415 }
 0x195   : > { %1496 = vmatpush3.xpose.msk.msra.mxu1 %vm332_vm2, %v416_v18 }
 0x196   : > { %1500 = vmatprep.subr.mxu1 %v1808_v0 }
 0x198   : > { %1498 = vmatmul.mubr.msk.f32.vlgmr.msra.gmra.mxu1 %vm332_vm2, %v2009_v14 }
 0x199   : > { %1502 = vmatprep.mubr.msk.f32.mxu1 %vm1809_vm0, %v1808_v0 }
 0x1e2   : > { %v402_v19 = vpop.f32.mrf.mxu1 }
 0x1e3   : > { %413 = vperm.xlu0 %1635, %v402_v19  }
 0x1e4   : > { %v1494_v20 = vpop.f32.mrf.mxu1 }
 0x258   : > { %v485_v21 = vpop.f32.mrf.mxu1 }
 0x25a   : > { %v1499_v22 = vpop.f32.mrf.mxu1 }
 0x25e   : > { %v414_v23 = vpop.permute.xlu0 %413 }
 0x25f   : > { %v486_v24 = vadd.f32 %v485_v21, %v414_v23 }
 0x261   : > { %v489_v25 = vsel %vm330_vm5, %v486_v24, -inf }
 0x262   : > { %v490_v26 = vsel %vm332_vm2, %v489_v25, -inf }
 0x263   : > { %491 = vmax.xlane.f32.xlu1 %v490_v26 }
 0x274   : > { %578 = vrot.lane.b32.xlu1 %v2009_v14, %s1811_s5 }
 0x278   : > { %501 = vrot.lane.b32.xlu1 %v2009_v14, %s1812_s6 }
 0x27c   : > { %655 = vrot.lane.b32.xlu1 %v2009_v14, %s1813_s7  ;;  %s2105_s7 = scalar_lea.hbm %s2147_s4, %s1447_s23 }
 0x2ec   : > { %v492_v27 = vpop.xlane.xlu1 %491 }
 0x2ed   : > { %v493_v28 = vsub.f32 %v489_v25, %v492_v27 }
 0x2ef   : > { %v494_v29 = vmul.f32 1.442695, %v493_v28 }
 0x2f0   : > { %v579_v30 = vpop.permute.xlu1 %578 }
 0x2f1   : > { %1637 = vpow2.f32 %v494_v29  ;;  %1508 = vmatmul.mubr.msk.f32.vlgmr.msra.gmra.mxu0 %vm332_vm2, %v579_v30 }
 0x2f2   : > { %1517 = vmatprep.mubr.msk.f32.mxu0 %vm1809_vm0, %v1808_v0 }
 0x2f4   : > { %v502_v31 = vpop.permute.xlu1 %501 }
 0x2f5   : > { %1501 = vmatpush3.msra.mxu1 %v502_v31 }
 0x2f6   : > { %1510 = vmatprep.subr.mxu1 %v1808_v0 }
 0x2f8   : > { %v656_v37 = vpop.permute.xlu1 %655 }
 0x2fe   : > { %v1638_v32 = vpop.eup %1637 }
 0x2ff   : > { %v496_v33 = vsel %vm332_vm2, %v1638_v32, 0.0 }
 0x300   : > { %497 = vadd.xlane.f32.xlu0 %v496_v33 }
 0x316   : > { %823 = vrot.lane.b32.xlu0 %v2009_v14, %s1814_s12  ;;  %s1314_s12 = scalar_lea.sflag [#allocation4], %s1968_s30 }
 0x389   : > { %v498_v34 = vpop.xlane.xlu0 %497 }
 0x38a   : > { %1639 = vrcp.f32 %v498_v34 }
 0x38d   : > { %v824_v38 = vpop.permute.xlu0 %823 }
 0x397   : > { %v1640_v35 = vpop.eup %1639 }
 0x398   : > { %v500_v36 = vmul.f32 %v1640_v35, %v1638_v32 }
 0x39a   : > { %1503 = vmatmul.mubr.msk.f32.vlgmr.msra.gmra.mxu1 %vm332_vm2, %v500_v36 }
 0x39b   : > { %1511 = vmatpush3.xpose.msk.msra.mxu1 %vm332_vm2, %v656_v37  ;;  %1512 = vmatprep.mubr.msk.f32.mxu1 %vm1809_vm0, %v1808_v0 }
 0x39c   : > { %1520 = vmatprep.subr.mxu1 %v1808_v0 }
 0x39e   : > { %1513 = vmatmul.mubr.msk.f32.vlgmr.msra.gmra.mxu1 %vm332_vm2, %v579_v30 }
 0x39f   : > { %1521 = vmatpush3.msra.mxu1 %v1994_v6  ;;  %1522 = vmatprep.mubr.msk.f32.mxu1 %vm1809_vm0, %v1808_v0 }
 0x3a0   : > { %1530 = vmatprep.subr.mxu1 %v1808_v0 }
 0x3a2   : > { %1523 = vmatmul.mubr.msk.f32.vlgmr.msra.gmra.mxu1 %vm332_vm2, %v824_v38 }
 0x3a3   : > { %1532 = vmatprep.mubr.msk.f32.mxu1 %vm1809_vm0, %v1808_v0 }
 0x3b1   : > { %v648_v39 = vpop.f32.mrf.mxu0 }
 0x3b2   : > { %653 = vperm.xlu1 %1636, %v648_v39  }
 0x3b3   : > { %v1509_v40 = vpop.f32.mrf.mxu0 }
 0x42d   : > { %v654_v43 = vpop.permute.xlu1 %653 }
 0x45a   : > { %v573_v41 = vpop.f32.mrf.mxu1 }
 0x45b   : > { %577 = vst.msk [vmem:[%s2052_s13] sm:$0xff] %vm332_vm2, %v573_v41 }
 0x45c   : > { %v1504_v42 = vpop.f32.mrf.mxu1 }
 0x45e   : > { %v725_v44 = vpop.f32.mrf.mxu1 }
 0x45f   : > { %v726_v45 = vadd.f32 %v725_v44, %v654_v43 }
 0x460   : > { %v1514_v46 = vpop.f32.mrf.mxu1 }
 0x461   : > { %v729_v47 = vsel %vm330_vm5, %v726_v45, -inf }
 0x462   : > { %v893_v48 = vpop.f32.mrf.mxu1  ;;  %v730_v49 = vsel %vm332_vm2, %v729_v47, -inf }
 0x463   : > { %731 = vmax.xlane.f32.xlu1 %v730_v49 }
 0x464   : > { %v1524_v50 = vpop.f32.mrf.mxu1 }
 0x474   : > { %741 = vrot.lane.b32.xlu1 %v2009_v14, %s1815_s25  ;;  %s1733_s25 = scalar_lea.vmem %s1328_s29, 128 }
 0x475   : > { %p1734_p11 = scmp.ne.s32.totalorder %s1328_s29, %s1733_s25 }
 0x477   : > { %p1735_p1 = pnand %p1734_p11, %p2163_p0 }
 0x478   : > { %900 = vrot.lane.b32.xlu1 %v2009_v14, %s1816_s26  ;;  %s1824_s26 = smov [#allocation8]  }
 0x479   : > { %p1736_p2 = pneg %p1735_p1 }
 0x47c   : > { %898 = vperm.xlu1 %1636, %v893_v48  }
 0x4ec   : > { %v732_v51 = vpop.xlane.xlu1 %731 }
 0x4ed   : > { %v733_v52 = vsub.f32 %v729_v47, %v732_v51 }
 0x4ef   : > { %v734_v53 = vmul.f32 1.442695, %v733_v52 }
 0x4f0   : > { %v742_v54 = vpop.permute.xlu1 %741 }
 0x4f1   : > { %1641 = vpow2.f32 %v734_v53  ;;  %1516 = vmatpush3.msra.mxu0 %v742_v54 }
 0x4f2   : > { %1525 = vmatprep.subr.mxu0 %v1808_v0 }
 0x4f4   : > { %v901_v60 = vpop.permute.xlu1 %900 }
 0x4f8   : > { %v899_v1 = vpop.permute.xlu1 %898 }
 0x4fe   : > { %v1642_v55 = vpop.eup %1641 }
 0x4ff   : > { %v736_v56 = vsel %vm332_vm2, %v1642_v55, 0.0 }
 0x500   : > { %737 = vadd.xlane.f32.xlu0 %v736_v56 }
 0x516   : > { %1068 = vrot.lane.b32.xlu0 %v2009_v14, %s1817_s24  ;;  %s1737_s24 = sshll.u32 %s1824_s26, 4  ;;  %s1738_s24 = int_to_ptr.vmem [resolvable:$false] %s1737_s24 }
 0x517   : > { %s1739_s19 = scalar_lea.vmem %s1738_s24, 256  ;;  %p1740_p6 = scmp.lt.s32.totalorder %s1328_s29, %s1738_s24 }
 0x518   : > { %p1741_p12 = scmp.lt.s32.totalorder %s1739_s19, %s1733_s25 }
 0x51a   : > { %p1742_p7 = por %p1741_p12, %p1740_p6 }
 0x51c   : > { %p1743_p9 = pnand %p1742_p7, %p1736_p2 }
 0x589   : > { %v738_v57 = vpop.xlane.xlu0 %737 }
 0x58a   : > { %1643 = vrcp.f32 %v738_v57 }
 0x58d   : > { %v1069_v61 = vpop.permute.xlu0 %1068 }
 0x597   : > { %v1644_v58 = vpop.eup %1643 }
 0x598   : > { %v740_v59 = vmul.f32 %v1644_v58, %v1642_v55 }
 0x59a   : > { %1518 = vmatmul.mubr.msk.f32.vlgmr.msra.gmra.mxu0 %vm332_vm2, %v740_v59 }
 0x59b   : > { %1526 = vmatpush3.xpose.msk.msra.mxu0 %vm332_vm2, %v901_v60  ;;  %1527 = vmatprep.mubr.msk.f32.mxu0 %vm1809_vm0, %v1808_v0 }
 0x59c   : > { %1535 = vmatprep.subr.mxu0 %v1808_v0 }
 0x59e   : > { %1528 = vmatmul.mubr.msk.f32.vlgmr.msra.gmra.mxu0 %vm332_vm2, %v824_v38 }
 0x59f   : > { %1536 = vmatpush3.msra.mxu0 %v1994_v6  ;;  %1537 = vmatprep.mubr.msk.f32.mxu0 %vm1809_vm0, %v1808_v0 }
 0x5a0   : > { %1545 = vmatprep.subr.mxu0 %v1808_v0 }
 0x5a2   : > { %1538 = vmatmul.mubr.msk.f32.vlgmr.msra.gmra.mxu0 %vm332_vm2, %v1069_v61 }
 0x5a3   : > { %1547 = vmatprep.mubr.msk.f32.mxu0 %vm1809_vm0, %v1808_v0 }
 0x65a   : > { %v813_v62 = vpop.f32.mrf.mxu0 }
 0x65c   : > { %v1519_v63 = vpop.f32.mrf.mxu0 }
 0x65e   : > { %v970_v2 = vpop.f32.mrf.mxu0 }
 0x65f   : > { %v971_v3 = vadd.f32 %v970_v2, %v899_v1 }
 0x660   : > { %v1529_v4 = vpop.f32.mrf.mxu0 }
 0x661   : > { %v974_v5 = vsel %vm330_vm5, %v971_v3, -inf }
 0x662   : > { %v1138_v6 = vpop.f32.mrf.mxu0  ;;  %v975_v7 = vsel %vm332_vm2, %v974_v5, -inf }
 0x663   : > { %976 = vmax.xlane.f32.xlu1 %v975_v7 }
 0x664   : > { %v1539_v10 = vpop.f32.mrf.mxu0 }
 0x674   : > { %986 = vrot.lane.b32.xlu1 %v2009_v14, %s1818_s27 }
 0x678   : > { %1145 = vrot.lane.b32.xlu1 %v2009_v14, %s1819_s28 }
 0x6ec   : > { %v977_v11 = vpop.xlane.xlu1 %976 }
 0x6ed   : > { %v978_v12 = vsub.f32 %v974_v5, %v977_v11 }
 0x6ef   : > { %v979_v13 = vmul.f32 1.442695, %v978_v12 }
 0x6f0   : > { %v987_v15 = vpop.permute.xlu1 %986 }
 0x6f1   : > { %1645 = vpow2.f32 %v979_v13  ;;  %1531 = vmatpush3.msra.mxu1 %v987_v15 }
 0x6f2   : > { %1540 = vmatprep.subr.mxu1 %v1808_v0 }
 0x6f4   : > { %v1146_v21 = vpop.permute.xlu1 %1145 }
 0x6fe   : > { %v1646_v16 = vpop.eup %1645 }
 0x6ff   : > { %v981_v17 = vsel %vm332_vm2, %v1646_v16, 0.0 }
 0x700   : > { %982 = vadd.xlane.f32.xlu0 %v981_v17 }
 0x716   : > { %1143 = vperm.xlu0 %1635, %v1138_v6  }
 0x789   : > { %v983_v18 = vpop.xlane.xlu0 %982 }
 0x78a   : > { %1647 = vrcp.f32 %v983_v18 }
 0x791   : > { %v1144_v24 = vpop.permute.xlu0 %1143 }
 0x797   : > { %v1648_v19 = vpop.eup %1647 }
 0x798   : > { %v985_v20 = vmul.f32 %v1648_v19, %v1646_v16 }
 0x79a   : > { %1533 = vmatmul.mubr.msk.f32.vlgmr.msra.gmra.mxu1 %vm332_vm2, %v985_v20 }
 0x79b   : > { %1541 = vmatpush3.xpose.msk.msra.mxu1 %vm332_vm2, %v1146_v21  ;;  %1542 = vmatprep.mubr.msk.f32.mxu1 %vm1809_vm0, %v1808_v0 }
 0x79e   : > { %1543 = vmatmul.mubr.msk.f32.vlgmr.msra.gmra.mxu1 %vm332_vm2, %v1069_v61 }
 0x85a   : > { %v1058_v22 = vpop.f32.mrf.mxu1 }
 0x85c   : > { %v1534_v23 = vpop.f32.mrf.mxu1 }
 0x85e   : > { %v1215_v25 = vpop.f32.mrf.mxu1 }
 0x85f   : > { %v1216_v26 = vadd.f32 %v1215_v25, %v1144_v24 }
 0x860   : > { %v1544_v27 = vpop.f32.mrf.mxu1 }
 0x861   : > { %v1219_v28 = vsel %vm330_vm5, %v1216_v26, -inf }
 0x862   : > { %v1220_v29 = vsel %vm332_vm2, %v1219_v28, -inf }
 0x863   : > { %1221 = vmax.xlane.f32.xlu1 %v1220_v29 }
 0x874   : > { %1231 = vrot.lane.b32.xlu1 %v2009_v14, %s1820_s8 }
 0x878   : > { %1063 = vrot.lane.b32.xlu1 %v1058_v22, %s1821_s9 }
 0x8ec   : > { %v1222_v0 = vpop.xlane.xlu1 %1221 }
 0x8ed   : > { %v1223_v30 = vsub.f32 %v1219_v28, %v1222_v0 }
 0x8ef   : > { %v1224_v31 = vmul.f32 1.442695, %v1223_v30 }
 0x8f0   : > { %v1232_v32 = vpop.permute.xlu1 %1231 }
 0x8f1   : > { %1649 = vpow2.f32 %v1224_v31  ;;  %1546 = vmatpush3.msra.mxu0 %v1232_v32 }
 0x8f4   : > { %v1064_v34 = vpop.permute.xlu1 %1063 }
 0x8fe   : > { %v1650_v33 = vpop.eup %1649 }
 0x8ff   : > { %v1226_v8 = vsel %vm332_vm2, %v1650_v33, 0.0 }
 0x900   : > { %1227 = vadd.xlane.f32.xlu0 %v1226_v8 }
 0x916   : > { %818 = vrot.lane.b32.xlu0 %v813_v62, %s1822_s10 }
 0x989   : > { %v1228_v9 = vpop.xlane.xlu0 %1227 }
 0x98a   : > { %1651 = vrcp.f32 %v1228_v9 }
 0x98d   : > { %v819_v14 = vpop.permute.xlu0 %818 }
 0x98e   : > { %822 = vst.msk [vmem:[%s2052_s13] sm:$0xff] %vm821_vm6, %v819_v14 }
 0x98f   : > { %1067 = vst.msk [vmem:[%s2052_s13] sm:$0xff] %vm1066_vm7, %v1064_v34 }
 0x997   : > { %v1652_v35 = vpop.eup %1651 }
 0x998   : > { %v1230_v36 = vmul.f32 %v1652_v35, %v1650_v33 }
 0x99a   : > { %1548 = vmatmul.mubr.msk.f32.vlgmr.msra.gmra.mxu0 %vm332_vm2, %v1230_v36 }
 0xa5a   : > { %v1303_v37 = vpop.f32.mrf.mxu0 }
 0xa5b   : > { %1308 = vrot.lane.b32.xlu1 %v1303_v37, %s1823_s21 }
 0xa5c   : > { %v1549_v38 = vpop.f32.mrf.mxu0 }
 0xacd   : > { %v1309_v39 = vpop.permute.xlu1 %1308 }
 0xace   : > { %1312 = vst.msk [vmem:[%s2052_s13] sm:$0xff] %vm1311_vm8, %v1309_v39 }
 0xacf   : > { %1746 = shalt.err (!%p1743_p9)
}
 0xad0   : > { %s1747_s13 = scalar_lea.hbm %s2105_s7, 128  ;;  %s1751_s28 = scalar_lea.hbm %s2147_s4, 256 }
 0xad1   : > { %p1748_p13 = scmp.ne.s32.totalorder %s2105_s7, %s1747_s13  ;;  %p1752_p4 = scmp.lt.s32.totalorder %s2105_s7, %s2147_s4 }
 0xad2   : > { %p1753_p8 = scmp.lt.s32.totalorder %s1751_s28, %s1747_s13 }
 0xad3   : > { %p1749_p5 = pnand %p1748_p13, %p2163_p0 }
 0xad4   : > { %p1754_p3 = por %p1753_p8, %p1752_p4 }
 0xad5   : > { %p1750_p10 = pneg %p1749_p5 }
 0xad7   : > { %p1755_p11 = pnand %p1754_p3, %p1750_p10 }
 0xad9   : > { %1758 = shalt.err (!%p1755_p11)
}
 0xada   : > { %1560 = dma.vmem_to_hbm [thread:$0]  (%p2163_p0), %s1328_s29, 128, %s2105_s7, %s1314_s12  }
 0xadb PF: > { %s1339_s10 = sand.u32 1, %s1789_s15   ;;  %p2164_p1 = scmp.ne.s32.totalorder %s2153_s22, 0 }
 0xadc   : > { %p2165_p2 = scmp.ge.s32.totalorder %s1801_s18, 2  ;;  %s1340_s21 = scalar_lea.sflag [#allocation4], %s1339_s10 }
 0xade   : > { %p1574_p6 = pnand %p2165_p2, %p2164_p1 }
 0xae0   : > { %p1575_p12 = pneg %p1574_p6 }
 0xae2   : > { %1784 = dma.done.wait (%p1575_p12), %s1340_s21, 128  }
 0xae3   : > { %1786 = vsyncadd (%p1575_p12), %s1340_s21, 4294967168  ;;  %p18_p7 = scmp.ge.s32.totalorder %s1922_s11, 4   ;;  %s2166_s15 = smov %s1793_s16 }
 0xae4   : > { %s2167_s16 = smov %s1797_s17  ;;  %s2168_s17 = smov %s1938_s20 }
 0xae5   : > { %s2169_s18 = smov %s1922_s11  ;;  %20 = sbr.rel (!%p18_p7) target bundleno = 6 (0x6), region = 89 }
 0xaea   :  { %1345 = vsyncpa [#allocation3], 1 }
 0xaeb   :  { %1347 = vsyncpa [#allocation3 + $0x1], 1 }
 0xaec   :  { %1348 = vsyncpa [#allocation6], 1 }
 0xaed   :  { %1349 = vsyncpa [#allocation4], 1 }
 0xaee   :  { %1351 = vsyncpa [#allocation4 + $0x1], 1 }

// kernel: tpu_custom_call.1
= control target key start
LH: loop header
LB: loop body
LE: loop exit
PB: predicated region body
PF: predicated region fallthrough
CT: control target
= control target key end

     0   :  { %9 = vsyncpa [#allocation3], 0  ;;  %s2495_s0 = inlined_call_operand.hbm [shape: f32[2,8,32], index: 0, kind: input, shape index: {}]   ;;  %s2496_s1 = inlined_call_operand.hbm [shape: f32[32,96], index: 1, kind: input, shape index: {}]   ;;  %s2497_s2 = inlined_call_operand.vmem [shape: f32[1,96], index: 2, kind: input, shape index: {}]   ;;  %s2498_s3 = inlined_call_operand.hbm [shape: f32[8,8], index: 3, kind: input, shape index: {}]   ;;  %s2499_s4 = inlined_call_operand.hbm [shape: f32[2,8,32], index: 4, kind: output, shape index: {}]  }
   0x1   :  { %11 = vsyncpa [#allocation3 + $0x1], 0 }
   0x2   :  { %12 = vsyncpa [#allocation6], 0 }
   0x3   :  { %13 = vsyncpa [#allocation4], 0 }
   0x4   :  { %15 = vsyncpa [#allocation4 + $0x1], 0  ;;  %s2084_s15 = smov 0   ;;  %s2086_s16 = smov 0  }
   0x5   :  { %s2088_s17 = smov 0   ;;  %s2090_s18 = smov 0  }
   0x6 LB: > { %s2105_s19 = sadd.s32 4294967295, %s2027_s18   ;;  %s1603_s20 = sadd.s32 4294967294, %s2027_s18   ;;  %s2027_s18 = sphi %s2090_s18, %s2521_s18   ;;  %s2023_s17 = sphi %s2088_s17, %s2520_s17   ;;  %s2019_s16 = sphi %s2086_s16, %s2519_s16   ;;  %s2015_s15 = sphi %s2084_s15, %s2518_s15  }
   0x7   : > { %p41_p0 = scmp.ne.s32.totalorder %s2019_s16, %s2015_s15  ;;  %p2500_p1 = scmp.eq.s32.totalorder %s2105_s19, 0 }
   0x8   : > { %p134_p3 = scmp.eq.s32.totalorder %s1603_s20, 1  ;;  %p1604_p5 = scmp.ge.s32.totalorder %s2027_s18, 1 }
   0x9   : > { %p2114_p4 = por %p2500_p1, %p41_p0  ;;  %p141_p7 = scmp.lt.s32.totalorder %s2027_s18, 3 }
   0xa   : > { %p2119_p6 = por %p134_p3, %p41_p0  ;;  %s2029_s24 = smov [#allocation5]  }
   0xb   : > { %s2504_s21 = scalar_select %p2114_p4, 1, 0 }
   0xc   : > { %s2505_s22 = scalar_select %p2119_p6, 1, 0 }
   0xd   : > { %p2124_p8 = pnand %p1604_p5, %p141_p7  ;;  %s153_s25 = sshll.u32 %s2029_s24, 4  ;;  %s154_s25 = int_to_ptr.vmem [resolvable:$true] %s153_s25 }
   0xe   : > { %s2030_s27 = smov [#allocation7]   ;;  %s1890_s29 = scalar_lea.vmem %s154_s25, 512 }
   0xf   : > { %s2506_s23 = scalar_select %p2124_p8, 1, 0 }
  0x10   : > { %p1749_p9 = pneg %p2124_p8  ;;  %s170_s28 = sshll.u32 %s2030_s27, 4  ;;  %s171_s28 = int_to_ptr.vmem [resolvable:$true] %s170_s28 }
  0x11   : > { %p1891_p13 = scmp.ne.s32.totalorder %s154_s25, %s1890_s29  ;;  %p1898_p5 = scmp.lt.s32.totalorder %s154_s25, %s154_s25 }
  0x12   : > { %p2133_p11 = pnand %p1749_p9, %p2500_p1  ;;  %p1899_p7 = scmp.lt.s32.totalorder %s1890_s29, %s1890_s29 }
  0x14   : > { %p1881_p12 = pneg %p2133_p11  ;;  %p1900_p10 = por %p1899_p7, %p1898_p5 }
  0x16   : > { %p1893_p0 = pnand %p1891_p13, %p1881_p12 }
  0x18   : > { %p1894_p3 = pneg %p1893_p0 }
  0x1a   : > { %p1901_p9 = pnand %p1900_p10, %p1894_p3 }
  0x1c   : > { %1904 = shalt.err (!%p1901_p9)
}
  0x1d   : > { %s2031_s30 = smov 128   ;;  %s2032_s5 = smov 8  }
  0x1e   : > { %1752 = dma.hbm_to_vmem [thread:$0]  (!%p2133_p11), %s2496_s1, 512, %s154_s25, [#allocation6], %s2031_s30, %s2031_s30, %s2032_s5  }
  0x1f   : > { %s1916_s8 = scalar_lea.vmem %s171_s28, 128  ;;  %p1924_p2 = scmp.lt.s32.totalorder %s171_s28, %s171_s28 }
  0x20   : > { %p1917_p1 = scmp.ne.s32.totalorder %s171_s28, %s1916_s8  ;;  %p1925_p6 = scmp.lt.s32.totalorder %s1916_s8, %s1916_s8 }
  0x22   : > { %p1919_p13 = pnand %p1917_p1, %p1881_p12  ;;  %p1926_p5 = por %p1925_p6, %p1924_p2 }
  0x24   : > { %p1920_p0 = pneg %p1919_p13 }
  0x26   : > { %p1927_p10 = pnand %p1926_p5, %p1920_p0 }
  0x28   : > { %1930 = shalt.err (!%p1927_p10)
}
  0x29   : > { %1755 = dma.hbm_to_vmem [thread:$0]  (!%p2133_p11), %s2498_s3, 128, %s171_s28, [#allocation6]  }
  0x2a   : > { %s2156_s11 = sadd.s32 1, %s2027_s18   ;;  %s28_s12 = sadd.s32 1, %s2023_s17 }
  0x2b   : > { %s25_s13 = ssub.s32 %s2027_s18, %s2156_s11  ;;  %p35_p1 = scmp.ne.s32.totalorder %s2023_s17, %s2019_s16 }
  0x2c   : > { %p26_p2 = scmp.eq.s32.totalorder %s25_s13, 0  ;;  %p36_p6 = scmp.eq.s32.totalorder %s2027_s18, 0 }
  0x2d   : > { %p2508_p12 = scmp.eq.s32.totalorder %s2105_s19, 1  ;;  %p1766_p7 = scmp.lt.s32.totalorder %s2027_s18, 2 }
  0x2e   : > { %s2172_s20 = scalar_select %p26_p2, %s2023_s17, %s28_s12  }
  0x2f   : > { %p2166_p3 = por %p2508_p12, %p35_p1  ;;  %p37_p9 = por %p36_p6, %p35_p1 }
  0x30   : > { %s181_s24 = sand.u32 1, %s2023_s17   ;;  %s1609_s26 = sshll.u32 %s2027_s18, 7 }
  0x31   : > { %s2509_s14 = scalar_select %p2166_p3, 1, 0 }
  0x32   : > { %s1608_s25 = sshll.u32 %s181_s24, 3  ;;  %s2179_s29 = scalar_lea.hbm %s2495_s0, %s1609_s26 }
  0x33   : > { %s185_s30 = scalar_lea.vmem [#allocation2], %s1608_s25  ;;  %p2181_p11 = pnand %p1766_p7, %p37_p9 }
  0x34   : > { %s192_s5 = sshll.u32 %s185_s30, 4  ;;  %s182_s7 = scalar_lea.sflag [#allocation3], %s181_s24  ;;  %s193_s5 = int_to_ptr.vmem [resolvable:$true] %s192_s5 }
  0x35   : > { %s1931_s8 = scalar_lea.hbm %s2179_s29, 128  ;;  %p1933_p0 = pneg %p2181_p11 }
  0x36   : > { %p1932_p13 = scmp.ne.s32.totalorder %s2179_s29, %s1931_s8  ;;  %s1936_s12 = scalar_lea.hbm %s2495_s0, 256 }
  0x37   : > { %p1937_p1 = scmp.lt.s32.totalorder %s2179_s29, %s2495_s0  ;;  %p1938_p2 = scmp.lt.s32.totalorder %s1936_s12, %s1931_s8 }
  0x38   : > { %p1934_p5 = pnand %p1933_p0, %p1932_p13 }
  0x39   : > { %p1939_p6 = por %p1938_p2, %p1937_p1 }
  0x3a   : > { %p1935_p10 = pneg %p1934_p5 }
  0x3c   : > { %p1940_p12 = pnand %p1939_p6, %p1935_p10 }
  0x3e   : > { %1943 = shalt.err (!%p1940_p12)
}
  0x3f   : > { %s1944_s26 = scalar_lea.vmem %s193_s5, 128  ;;  %s2033_s24 = smov [#allocation2]  }
  0x40   : > { %p1945_p7 = scmp.ne.s32.totalorder %s193_s5, %s1944_s26  ;;  %s1949_s27 = sshll.u32 %s2033_s24, 4  ;;  %s1950_s27 = int_to_ptr.vmem [resolvable:$false] %s1949_s27 }
  0x41   : > { %s1951_s28 = scalar_lea.vmem %s1950_s27, 256  ;;  %p1952_p13 = scmp.lt.s32.totalorder %s193_s5, %s1950_s27 }
  0x42   : > { %p1947_p9 = pnand %p1945_p7, %p1933_p0  ;;  %p1953_p5 = scmp.lt.s32.totalorder %s1951_s28, %s1944_s26 }
  0x44   : > { %p1948_p3 = pneg %p1947_p9  ;;  %p1954_p4 = por %p1953_p5, %p1952_p13 }
  0x46   : > { %p1955_p8 = pnand %p1954_p4, %p1948_p3 }
  0x48   : > { %1958 = shalt.err (!%p1955_p8)
}
  0x49   : > { %1759 = dma.hbm_to_vmem [thread:$0]  (!%p2181_p11), %s2179_s29, 128, %s193_s5, %s182_s7  }
  0x4a   : > { %p2511_p10 = scmp.ne.s32.totalorder %s2506_s23, 0 }
  0x4b   : > { %s2202_s30 = sand.u32 (!%p2511_p10), 1, %s2019_s16   ;;  %p2512_p4 = scmp.ne.s32.totalorder (!%p2511_p10), %s2504_s21, 0 }
  0x4c   : > { %201 = sbr.rel (%p2511_p10) target bundleno = 2804 (0xaf4), region = 36  ;;  %s1611_s8 = sshll.u32 (!%p2511_p10), %s2202_s30, 3 }
  0x4d   : > { %s204_s9 = scalar_lea.sflag (!%p2511_p10), [#allocation3], %s2202_s30  ;;  %s207_s10 = scalar_lea.vmem (!%p2511_p10), [#allocation2], %s1611_s8 }
  0x51   : > { %2002 = dma.done.wait (%p2512_p4), %s204_s9, 128  }
  0x52   : > { %2004 = vsyncadd (%p2512_p4), %s204_s9, 4294967168  ;;  %p2513_p8 = scmp.eq.s32.totalorder %s2105_s19, 0 }
  0x54   : > { %2006 = dma.done.wait (%p2513_p8), [#allocation6], 640   ;;  %p2514_p3 = pmov %p2513_p8 }
  0x55   : > { %v2034_v0 = vmov 0.0   ;;  %vm2035_vm0 = vmmov 0   ;;  %v244_v1 = vld [vmem:[#allocation5 + $0x18] sm:$0xff]  ;;  %v243_v2 = vld [vmem:[#allocation5 + $0x10] sm:$0xff]  ;;  %v242_v3 = vld [vmem:[#allocation5 + $0x8] sm:$0xff]  ;;  %vm252_vm1 = vcmask 261120   ;;  %v326_v22 = vlaneseq }
  0x56   : > { %2008 = vsyncadd (%p2514_p3), [#allocation6], 4294966656  ;;  %1666 = vmatprep.subr.mxu0 %v2034_v0  ;;  %1674 = vmatprep.mubr.msk.f32.mxu0 %vm2035_vm0, %v2034_v0  ;;  %v241_v4 = vld [vmem:[#allocation5] sm:$0xff]  ;;  %v240_v5 = vld [vmem:[%s207_s10] sm:$0xff]  ;;  %v2036_v7 = vmov 1   ;;  %v2037_v8 = vmov 0  }
  0x57   : > { %1677 = vmatprep.subr.mxu1 %v2034_v0  ;;  %1679 = vmatprep.mubr.msk.f32.mxu1 %vm2035_vm0, %v2034_v0  ;;  %v2228_v6 = vld [vmem:[#allocation7] sm:$0xff]  ;;  %v1615_v9 = vld [vmem:[%s2497_s2] ss:$0 sm:$0xff]  ;;  %vm332_vm2 = vcmask 64512   ;;  %s2038_s29 = smov 96   ;;  %v2039_v16 = vmov 2  }
  0x58   : > { %1667 = vmatpush3.msra.mxu0 %v244_v1  ;;  %1678 = vmatpush3.msra.mxu1 %v2228_v6  ;;  %v2040_v17 = vmov 4   ;;  %v2041_v18 = vmov 3   ;;  %v2042_v19 = vmov 7   ;;  %v2043_v20 = vmov 5   ;;  %s2044_s5 = smov 120   ;;  %s2046_s6 = smov 64  }
  0x59   : > { %1668 = vmatprep.subr.mxu0 %v2034_v0  ;;  %1682 = vmatprep.subr.mxu1 %v2034_v0  ;;  %v2045_v21 = vmov 6   ;;  %v2261_v24 = vshrl.u32 %v326_v22, 7  ;;  %v2263_v25 = vand.u32 127, %v326_v22  ;;  %s2047_s7 = smov 88   ;;  %s2048_s12 = smov 112   ;;  %vm916_vm12 = vcmask 130112  }
  0x5a   : > { %1669 = vmatpush3.msra.mxu0 %v243_v2  ;;  %1831 = vset.pattern.permute.xlu1 %v2036_v7  ;;  %s2353_s13 = scalar_lea.vmem [#allocation8], %s1611_s8  ;;  %s2049_s25 = smov 56   ;;  %vm1207_vm13 = vcmask 195712   ;;  %vm1498_vm14 = vcmask 261312  }
  0x5b   : > { %1670 = vmatprep.subr.mxu0 %v2034_v0  ;;  %1830 = vset.pattern.permute.xlu0 %v2037_v8  ;;  %v2267_v27 = vsub.s32 %v2263_v25, %v2261_v24  ;;  %vm330_vm11 = vcmp.le.s32.totalorder %v2263_v25, %v2261_v24  ;;  %s2050_s26 = smov 104   ;;  %s2051_s24 = smov 80  }
  0x5c   : > { %1671 = vmatpush3.msra.mxu0 %v242_v3  ;;  %s2052_s27 = smov 48   ;;  %s2053_s28 = smov 72  }
  0x5d   : > { %1672 = vmatprep.subr.mxu0 %v2034_v0  ;;  %vm415_vm3 = vcmp.eq.s32.totalorder %v2267_v27, 4294967290  ;;  %vm407_vm4 = vcmp.eq.s32.totalorder %v2267_v27, 4294967289  ;;  %vm422_vm5 = vcmp.eq.s32.totalorder %v2267_v27, 4294967291  ;;  %vm429_vm6 = vcmp.eq.s32.totalorder %v2267_v27, 4294967292  ;;  %s2054_s8 = smov 40   ;;  %s2055_s9 = smov 16  }
  0x5e   : > { %1673 = vmatpush3.msra.mxu0 %v241_v4  ;;  %vm436_vm7 = vcmp.eq.s32.totalorder %v2267_v27, 4294967293  ;;  %vm443_vm8 = vcmp.eq.s32.totalorder %v2267_v27, 4294967294  ;;  %vm450_vm9 = vcmp.eq.s32.totalorder %v2267_v27, 4294967295  ;;  %vm457_vm10 = vcmp.eq.s32.totalorder %v2267_v27, 0  ;;  %s2056_s10 = smov 8   ;;  %s2057_s21 = smov 24  }
  0x5f   : > { %1675 = vmatmul.mubr.msk.f32.vlgmr.msra.gmra.mxu0 %vm252_vm1, %v240_v5  ;;  %1692 = vmatprep.subr.mxu0 %v2034_v0  ;;  %s1634_s23 = sshll.u32 %s2105_s19, 7  ;;  %p2515_p0 = scmp.ne.s32.totalorder %s2509_s14, 0 }
  0x60   : > { %1694 = vmatprep.mubr.msk.f32.mxu0 %vm2035_vm0, %v2034_v0  ;;  %1693 = vmatpush3.msra.mxu0 %v2228_v6 }
  0x61   : > { %1702 = vmatprep.subr.mxu0 %v2034_v0 }
 0x11f   : > { %v322_v10 = vpop.f32.mrf.mxu0 }
 0x120   : > { %v2239_v11 = vadd.f32 %v1615_v9, %v322_v10 }
 0x121   : > { %v1676_v12 = vpop.f32.mrf.mxu0 }
 0x122   : > { %464 = vrot.lane.b32.xlu0 %v2239_v11, %s2038_s29  ;;  %1680 = vmatmul.mubr.msk.f32.vlgmr.msra.gmra.mxu1 %vm332_vm2, %v2239_v11  ;;  %s1514_s29 = sshll.u32 %s2353_s13, 4  ;;  %s1515_s29 = int_to_ptr.vmem [resolvable:$true] %s1514_s29 }
 0x123   : > { %1684 = vmatprep.mubr.msk.f32.mxu1 %vm2035_vm0, %v2034_v0 }
 0x194   : > { %v465_v13 = vpop.permute.xlu0 %464 }
 0x195   : > { %1683 = vmatpush3.xpose.msk.msra.mxu1 %vm332_vm2, %v465_v13 }
 0x196   : > { %1687 = vmatprep.subr.mxu1 %v2034_v0 }
 0x198   : > { %1685 = vmatmul.mubr.msk.f32.vlgmr.msra.gmra.mxu1 %vm332_vm2, %v2239_v11 }
 0x199   : > { %1689 = vmatprep.mubr.msk.f32.mxu1 %vm2035_vm0, %v2034_v0 }
 0x1e2   : > { %v402_v14 = vpop.f32.mrf.mxu1 }
 0x1e3   : > { %417 = vperm.xlu1 %1831, %v402_v14   ;;  %410 = vperm.xlu0 %1830, %v402_v14  }
 0x1e4   : > { %v1681_v15 = vpop.f32.mrf.mxu1 }
 0x1e7   : > { %1832 = vset.pattern.permute.xlu1 %v2039_v16  ;;  %1834 = vset.pattern.permute.xlu0 %v2040_v17 }
 0x1e8   : > { %424 = vperm.xlu1 %1832, %v402_v14   ;;  %438 = vperm.xlu0 %1834, %v402_v14  }
 0x1ec   : > { %1833 = vset.pattern.permute.xlu1 %v2041_v18  ;;  %1837 = vset.pattern.permute.xlu0 %v2042_v19 }
 0x1ed   : > { %431 = vperm.xlu1 %1833, %v402_v14   ;;  %459 = vperm.xlu0 %1837, %v402_v14  }
 0x1f1   : > { %1835 = vset.pattern.permute.xlu1 %v2043_v20  ;;  %627 = vrot.lane.b32.xlu0 %v2239_v11, %s2044_s5 }
 0x1f2   : > { %445 = vperm.xlu1 %1835, %v402_v14   ;;  %1841 = vset.pattern.permute.xlu0 %v2041_v18 }
 0x1f6   : > { %1836 = vset.pattern.permute.xlu1 %v2045_v21 }
 0x1f7   : > { %452 = vperm.xlu1 %1836, %v402_v14  }
 0x1fb   : > { %1838 = vset.pattern.permute.xlu1 %v2037_v8 }
 0x258   : > { %v534_v23 = vpop.f32.mrf.mxu1 }
 0x25a   : > { %v1686_v26 = vpop.f32.mrf.mxu1 }
 0x25e   : > { %v418_v28 = vpop.permute.xlu1 %417  ;;  %v411_v29 = vpop.permute.xlu0 %410 }
 0x25f   : > { %v420_v30 = vsel %vm415_vm3, %v418_v28, 0.0  ;;  %v413_v31 = vsel %vm407_vm4, %v411_v29, 0.0 }
 0x260   : > { %v421_v35 = vadd.f32 %v420_v30, %v413_v31 }
 0x263   : > { %v425_v32 = vpop.permute.xlu1 %424  ;;  %v439_v33 = vpop.permute.xlu0 %438 }
 0x264   : > { %v427_v34 = vsel %vm422_vm5, %v425_v32, 0.0  ;;  %v441_v42 = vsel %vm436_vm7, %v439_v33, 0.0 }
 0x265   : > { %v428_v36 = vadd.f32 %v427_v34, %v421_v35 }
 0x268   : > { %v432_v37 = vpop.permute.xlu1 %431  ;;  %v460_v38 = vpop.permute.xlu0 %459 }
 0x269   : > { %v434_v39 = vsel %vm429_vm6, %v432_v37, 0.0  ;;  %v462_v50 = vsel %vm457_vm10, %v460_v38, 0.0 }
 0x26a   : > { %v435_v40 = vadd.f32 %v434_v39, %v428_v36 }
 0x26c   : > { %v2282_v41 = vpop.permute.xlu0 %627  ;;  %v442_v44 = vadd.f32 %v441_v42, %v435_v40 }
 0x26d   : > { %v446_v43 = vpop.permute.xlu1 %445  ;;  %1695 = vmatmul.mubr.msk.f32.vlgmr.msra.gmra.mxu0 %vm332_vm2, %v2282_v41 }
 0x26e   : > { %1704 = vmatprep.mubr.msk.f32.mxu0 %vm2035_vm0, %v2034_v0  ;;  %v448_v45 = vsel %vm443_vm8, %v446_v43, 0.0 }
 0x26f   : > { %v449_v46 = vadd.f32 %v448_v45, %v442_v44 }
 0x272   : > { %v453_v47 = vpop.permute.xlu1 %452 }
 0x273   : > { %v455_v48 = vsel %vm450_vm9, %v453_v47, 0.0 }
 0x274   : > { %v456_v49 = vadd.f32 %v455_v48, %v449_v46 }
 0x276   : > { %v463_v51 = vadd.f32 %v462_v50, %v456_v49 }
 0x278   : > { %v535_v52 = vadd.f32 %v534_v23, %v463_v51 }
 0x27a   : > { %v538_v53 = vsel %vm330_vm11, %v535_v52, -inf }
 0x27b   : > { %v539_v54 = vsel %vm332_vm2, %v538_v53, -inf }
 0x27c   : > { %540 = vmax.xlane.f32.xlu1 %v539_v54 }
 0x28d   : > { %550 = vrot.lane.b32.xlu1 %v2239_v11, %s2046_s6 }
 0x305   : > { %v541_v55 = vpop.xlane.xlu1 %540 }
 0x306   : > { %v542_v56 = vsub.f32 %v538_v53, %v541_v55 }
 0x308   : > { %v543_v57 = vmul.f32 1.442695, %v542_v56 }
 0x309   : > { %v551_v58 = vpop.permute.xlu1 %550 }
 0x30a   : > { %1863 = vpow2.f32 %v543_v57  ;;  %1688 = vmatpush3.msra.mxu1 %v551_v58 }
 0x30b   : > { %1697 = vmatprep.subr.mxu1 %v2034_v0 }
 0x317   : > { %v1864_v59 = vpop.eup %1863 }
 0x318   : > { %v545_v60 = vsel %vm332_vm2, %v1864_v59, 0.0 }
 0x319   : > { %546 = vadd.xlane.f32.xlu0 %v545_v60 }
 0x32d   : > { %v697_v61 = vpop.f32.mrf.mxu0 }
 0x32e   : > { %703 = vperm.xlu1 %1838, %v697_v61  }
 0x32f   : > { %750 = vrot.lane.b32.xlu0 %v2239_v11, %s2047_s7  ;;  %v1696_v62 = vpop.f32.mrf.mxu0  ;;  %s2457_s7 = scalar_lea.hbm %s2499_s4, %s1634_s23 }
 0x332   : > { %1839 = vset.pattern.permute.xlu1 %v2036_v7 }
 0x333   : > { %721 = vperm.xlu0 %1841, %v697_v61   ;;  %709 = vperm.xlu1 %1839, %v697_v61  }
 0x337   : > { %1844 = vset.pattern.permute.xlu0 %v2045_v21  ;;  %1840 = vset.pattern.permute.xlu1 %v2039_v16 }
 0x338   : > { %739 = vperm.xlu0 %1844, %v697_v61   ;;  %715 = vperm.xlu1 %1840, %v697_v61  }
 0x33c   : > { %918 = vrot.lane.b32.xlu0 %v2239_v11, %s2048_s12  ;;  %1842 = vset.pattern.permute.xlu1 %v2040_v17  ;;  %s1501_s12 = scalar_lea.sflag [#allocation4], %s2202_s30 }
 0x33d   : > { %727 = vperm.xlu1 %1842, %v697_v61   ;;  %1848 = vset.pattern.permute.xlu0 %v2039_v16 }
 0x341   : > { %1843 = vset.pattern.permute.xlu1 %v2043_v20 }
 0x342   : > { %733 = vperm.xlu1 %1843, %v697_v61  }
 0x346   : > { %1845 = vset.pattern.permute.xlu1 %v2042_v19 }
 0x347   : > { %745 = vperm.xlu1 %1845, %v697_v61  }
 0x34b   : > { %1846 = vset.pattern.permute.xlu1 %v2037_v8 }
 0x3a2   : > { %v547_v63 = vpop.xlane.xlu0 %546 }
 0x3a3   : > { %1865 = vrcp.f32 %v547_v63 }
 0x3a6   : > { %v751_v2 = vpop.permute.xlu0 %750 }
 0x3a9   : > { %v704_v1 = vpop.permute.xlu1 %703 }
 0x3aa   : > { %v706_v12 = vsel %vm407_vm4, %v704_v1, 0.0 }
 0x3ae   : > { %v722_v3 = vpop.permute.xlu0 %721  ;;  %v710_v4 = vpop.permute.xlu1 %709 }
 0x3af   : > { %v712_v9 = vsel %vm415_vm3, %v710_v4, 0.0  ;;  %v724_v26 = vsel %vm429_vm6, %v722_v3, 0.0 }
 0x3b0   : > { %v1866_v5 = vpop.eup %1865  ;;  %v713_v13 = vadd.f32 %v712_v9, %v706_v12 }
 0x3b1   : > { %v549_v10 = vmul.f32 %v1866_v5, %v1864_v59 }
 0x3b3   : > { %1690 = vmatmul.mubr.msk.f32.vlgmr.msra.gmra.mxu1 %vm332_vm2, %v549_v10  ;;  %v716_v14 = vpop.permute.xlu1 %715  ;;  %v740_v15 = vpop.permute.xlu0 %739 }
 0x3b4   : > { %1698 = vmatpush3.xpose.msk.msra.mxu1 %vm332_vm2, %v751_v2  ;;  %v718_v22 = vsel %vm422_vm5, %v716_v14, 0.0  ;;  %1699 = vmatprep.mubr.msk.f32.mxu1 %vm2035_vm0, %v2034_v0  ;;  %v742_v36 = vsel %vm450_vm9, %v740_v15, 0.0 }
 0x3b5   : > { %v719_v23 = vadd.f32 %v718_v22, %v713_v13  ;;  %1707 = vmatprep.subr.mxu1 %v2034_v0 }
 0x3b7   : > { %1700 = vmatmul.mubr.msk.f32.vlgmr.msra.gmra.mxu1 %vm332_vm2, %v2282_v41  ;;  %v725_v29 = vadd.f32 %v724_v26, %v719_v23  ;;  %v2337_v30 = vpop.permute.xlu0 %918 }
 0x3b8   : > { %v728_v28 = vpop.permute.xlu1 %727  ;;  %1708 = vmatpush3.msra.mxu1 %v2228_v6  ;;  %1709 = vmatprep.mubr.msk.f32.mxu1 %vm2035_vm0, %v2034_v0 }
 0x3b9   : > { %1717 = vmatprep.subr.mxu1 %v2034_v0  ;;  %v730_v31 = vsel %vm436_vm7, %v728_v28, 0.0 }
 0x3ba   : > { %v731_v32 = vadd.f32 %v730_v31, %v725_v29 }
 0x3bb   : > { %1710 = vmatmul.mubr.msk.f32.vlgmr.msra.gmra.mxu1 %vm332_vm2, %v2337_v30 }
 0x3bc   : > { %1719 = vmatprep.mubr.msk.f32.mxu1 %vm2035_vm0, %v2034_v0 }
 0x3bd   : > { %v734_v33 = vpop.permute.xlu1 %733 }
 0x3be   : > { %v736_v34 = vsel %vm443_vm8, %v734_v33, 0.0 }
 0x3bf   : > { %v737_v35 = vadd.f32 %v736_v34, %v731_v32 }
 0x3c1   : > { %v743_v37 = vadd.f32 %v742_v36, %v737_v35 }
 0x3c2   : > { %v746_v38 = vpop.permute.xlu1 %745 }
 0x3c3   : > { %v748_v39 = vsel %vm457_vm10, %v746_v38, 0.0 }
 0x3c4   : > { %v749_v42 = vadd.f32 %v748_v39, %v743_v37 }
 0x473   : > { %v622_v40 = vpop.f32.mrf.mxu1 }
 0x474   : > { %626 = vst.msk [vmem:[%s2353_s13] sm:$0xff] %vm332_vm2, %v622_v40 }
 0x475   : > { %v1691_v41 = vpop.f32.mrf.mxu1 }
 0x477   : > { %v820_v43 = vpop.f32.mrf.mxu1 }
 0x478   : > { %v821_v44 = vadd.f32 %v820_v43, %v749_v42 }
 0x479   : > { %v1701_v45 = vpop.f32.mrf.mxu1 }
 0x47a   : > { %v824_v46 = vsel %vm330_vm11, %v821_v44, -inf }
 0x47b   : > { %v988_v47 = vpop.f32.mrf.mxu1  ;;  %v825_v48 = vsel %vm332_vm2, %v824_v46, -inf }
 0x47c   : > { %826 = vmax.xlane.f32.xlu1 %v825_v48 }
 0x47d   : > { %v1711_v49 = vpop.f32.mrf.mxu1 }
 0x48d   : > { %836 = vrot.lane.b32.xlu1 %v2239_v11, %s2049_s25  ;;  %s1959_s25 = scalar_lea.vmem %s1515_s29, 128 }
 0x48e   : > { %p1960_p11 = scmp.ne.s32.totalorder %s1515_s29, %s1959_s25 }
 0x490   : > { %p1961_p1 = pnand %p1960_p11, %p2515_p0 }
 0x491   : > { %994 = vperm.xlu1 %1846, %v988_v47  }
 0x492   : > { %p1962_p2 = pneg %p1961_p1 }
 0x495   : > { %1847 = vset.pattern.permute.xlu1 %v2036_v7 }
 0x496   : > { %1000 = vperm.xlu1 %1847, %v988_v47  }
 0x49a   : > { %1849 = vset.pattern.permute.xlu1 %v2041_v18 }
 0x49b   : > { %1012 = vperm.xlu1 %1849, %v988_v47  }
 0x49f   : > { %1850 = vset.pattern.permute.xlu1 %v2040_v17 }
 0x4a0   : > { %1018 = vperm.xlu1 %1850, %v988_v47  }
 0x4a4   : > { %1852 = vset.pattern.permute.xlu1 %v2045_v21 }
 0x4a5   : > { %1030 = vperm.xlu1 %1852, %v988_v47  }
 0x4a9   : > { %1853 = vset.pattern.permute.xlu1 %v2042_v19 }
 0x4aa   : > { %1036 = vperm.xlu1 %1853, %v988_v47  }
 0x4ae   : > { %1209 = vrot.lane.b32.xlu1 %v2239_v11, %s2050_s26  ;;  %s2058_s26 = smov [#allocation8]  }
 0x4af   : > { %1855 = vset.pattern.permute.xlu1 %v2036_v7 }
 0x505   : > { %v827_v50 = vpop.xlane.xlu1 %826 }
 0x506   : > { %v828_v51 = vsub.f32 %v824_v46, %v827_v50 }
 0x508   : > { %v829_v52 = vmul.f32 1.442695, %v828_v51 }
 0x509   : > { %v837_v53 = vpop.permute.xlu1 %836 }
 0x50a   : > { %1867 = vpow2.f32 %v829_v52  ;;  %1703 = vmatpush3.msra.mxu0 %v837_v53 }
 0x50b   : > { %1712 = vmatprep.subr.mxu0 %v2034_v0 }
 0x50d   : > { %v995_v54 = vpop.permute.xlu1 %994 }
 0x50e   : > { %v997_v56 = vsel %vm407_vm4, %v995_v54, 0.0 }
 0x511   : > { %v1001_v55 = vpop.permute.xlu1 %1000 }
 0x512   : > { %v1003_v57 = vsel %vm415_vm3, %v1001_v55, 0.0 }
 0x513   : > { %v1004_v58 = vadd.f32 %v1003_v57, %v997_v56 }
 0x516   : > { %v1013_v60 = vpop.permute.xlu1 %1012 }
 0x517   : > { %v1868_v59 = vpop.eup %1867  ;;  %v1015_v9 = vsel %vm429_vm6, %v1013_v60, 0.0 }
 0x518   : > { %v831_v7 = vsel %vm332_vm2, %v1868_v59, 0.0 }
 0x519   : > { %832 = vadd.xlane.f32.xlu0 %v831_v7 }
 0x51b   : > { %v1019_v62 = vpop.permute.xlu1 %1018 }
 0x520   : > { %v1031_v1 = vpop.permute.xlu1 %1030 }
 0x521   : > { %v1033_v26 = vsel %vm450_vm9, %v1031_v1, 0.0 }
 0x525   : > { %v1037_v14 = vpop.permute.xlu1 %1036 }
 0x526   : > { %v1039_v29 = vsel %vm457_vm10, %v1037_v14, 0.0 }
 0x529   : > { %v1210_v31 = vpop.permute.xlu1 %1209 }
 0x52f   : > { %1041 = vrot.lane.b32.xlu0 %v2239_v11, %s2051_s24  ;;  %s1963_s24 = sshll.u32 %s2058_s26, 4  ;;  %s1964_s24 = int_to_ptr.vmem [resolvable:$false] %s1963_s24 }
 0x530   : > { %s1965_s19 = scalar_lea.vmem %s1964_s24, 256  ;;  %p1966_p6 = scmp.lt.s32.totalorder %s1515_s29, %s1964_s24 }
 0x531   : > { %p1967_p12 = scmp.lt.s32.totalorder %s1965_s19, %s1959_s25 }
 0x533   : > { %1006 = vperm.xlu0 %1848, %v988_v47   ;;  %p1968_p7 = por %p1967_p12, %p1966_p6 }
 0x535   : > { %p1969_p9 = pnand %p1968_p7, %p1962_p2 }
 0x537   : > { %1851 = vset.pattern.permute.xlu0 %v2043_v20 }
 0x538   : > { %1024 = vperm.xlu0 %1851, %v988_v47  }
 0x53c   : > { %1854 = vset.pattern.permute.xlu0 %v2037_v8  ;;  %v1021_v8 = vsel %vm436_vm7, %v1019_v62, 0.0 }
 0x5a2   : > { %v833_v61 = vpop.xlane.xlu0 %832 }
 0x5a3   : > { %1869 = vrcp.f32 %v833_v61 }
 0x5a6   : > { %v1042_v63 = vpop.permute.xlu0 %1041 }
 0x5ae   : > { %v1007_v2 = vpop.permute.xlu0 %1006 }
 0x5af   : > { %v1009_v3 = vsel %vm422_vm5, %v1007_v2, 0.0 }
 0x5b0   : > { %v1870_v4 = vpop.eup %1869  ;;  %v1010_v5 = vadd.f32 %v1009_v3, %v1004_v58 }
 0x5b1   : > { %v835_v10 = vmul.f32 %v1870_v4, %v1868_v59 }
 0x5b2   : > { %v1016_v12 = vadd.f32 %v1015_v9, %v1010_v5 }
 0x5b3   : > { %v1025_v13 = vpop.permute.xlu0 %1024  ;;  %1705 = vmatmul.mubr.msk.f32.vlgmr.msra.gmra.mxu0 %vm332_vm2, %v835_v10 }
 0x5b4   : > { %v1022_v15 = vadd.f32 %v1021_v8, %v1016_v12  ;;  %v1027_v22 = vsel %vm443_vm8, %v1025_v13, 0.0  ;;  %1713 = vmatpush3.xpose.msk.msra.mxu0 %vm332_vm2, %v1042_v63  ;;  %1714 = vmatprep.mubr.msk.f32.mxu0 %vm2035_vm0, %v2034_v0 }
 0x5b5   : > { %1722 = vmatprep.subr.mxu0 %v2034_v0 }
 0x5b6   : > { %v1028_v23 = vadd.f32 %v1027_v22, %v1022_v15 }
 0x5b7   : > { %1715 = vmatmul.mubr.msk.f32.vlgmr.msra.gmra.mxu0 %vm332_vm2, %v2337_v30 }
 0x5b8   : > { %v1034_v28 = vadd.f32 %v1033_v26, %v1028_v23  ;;  %1723 = vmatpush3.msra.mxu0 %v2228_v6  ;;  %1724 = vmatprep.mubr.msk.f32.mxu0 %vm2035_vm0, %v2034_v0 }
 0x5b9   : > { %1732 = vmatprep.subr.mxu0 %v2034_v0 }
 0x5ba   : > { %v1040_v32 = vadd.f32 %v1039_v29, %v1034_v28 }
 0x5bb   : > { %1725 = vmatmul.mubr.msk.f32.vlgmr.msra.gmra.mxu0 %vm332_vm2, %v1210_v31 }
 0x5bc   : > { %1734 = vmatprep.mubr.msk.f32.mxu0 %vm2035_vm0, %v2034_v0 }
 0x673   : > { %v2404_v33 = vpop.f32.mrf.mxu0 }
 0x675   : > { %v1706_v30 = vpop.f32.mrf.mxu0 }
 0x677   : > { %v1111_v34 = vpop.f32.mrf.mxu0 }
 0x678   : > { %v1112_v6 = vadd.f32 %v1111_v34, %v1040_v32 }
 0x679   : > { %v1716_v35 = vpop.f32.mrf.mxu0 }
 0x67a   : > { %v1115_v36 = vsel %vm330_vm11, %v1112_v6, -inf }
 0x67b   : > { %v1279_v37 = vpop.f32.mrf.mxu0  ;;  %v1116_v38 = vsel %vm332_vm2, %v1115_v36, -inf }
 0x67c   : > { %1117 = vmax.xlane.f32.xlu0 %v1116_v38 }
 0x67d   : > { %v1726_v39 = vpop.f32.mrf.mxu0 }
 0x692   : > { %1127 = vrot.lane.b32.xlu0 %v2239_v11, %s2052_s27 }
 0x696   : > { %1285 = vperm.xlu0 %1854, %v1279_v37  }
 0x69a   : > { %1856 = vset.pattern.permute.xlu0 %v2039_v16 }
 0x69b   : > { %1297 = vperm.xlu0 %1856, %v1279_v37  }
 0x69f   : > { %1859 = vset.pattern.permute.xlu0 %v2043_v20 }
 0x6a0   : > { %1315 = vperm.xlu0 %1859, %v1279_v37  }
 0x6a4   : > { %1862 = vset.pattern.permute.xlu0 %v2042_v19 }
 0x705   : > { %v1118_v40 = vpop.xlane.xlu0 %1117 }
 0x706   : > { %v1119_v41 = vsub.f32 %v1115_v36, %v1118_v40 }
 0x708   : > { %v1120_v42 = vmul.f32 1.442695, %v1119_v41 }
 0x709   : > { %v1128_v43 = vpop.permute.xlu0 %1127 }
 0x70a   : > { %1871 = vpow2.f32 %v1120_v42  ;;  %1718 = vmatpush3.msra.mxu1 %v1128_v43 }
 0x70b   : > { %1727 = vmatprep.subr.mxu1 %v2034_v0 }
 0x717   : > { %v1872_v44 = vpop.eup %1871 }
 0x718   : > { %v1122_v45 = vsel %vm332_vm2, %v1872_v44, 0.0 }
 0x719   : > { %1123 = vadd.xlane.f32.xlu1 %v1122_v45 }
 0x72a   : > { %1332 = vrot.lane.b32.xlu1 %v2239_v11, %s2053_s28 }
 0x72e   : > { %1291 = vperm.xlu1 %1855, %v1279_v37  }
 0x732   : > { %1857 = vset.pattern.permute.xlu1 %v2041_v18  ;;  %v1286_v18 = vpop.permute.xlu0 %1285 }
 0x733   : > { %1303 = vperm.xlu1 %1857, %v1279_v37   ;;  %v1288_v48 = vsel %vm407_vm4, %v1286_v18, 0.0 }
 0x736   : > { %v1298_v49 = vpop.permute.xlu0 %1297 }
 0x737   : > { %1858 = vset.pattern.permute.xlu1 %v2040_v17  ;;  %v1300_v52 = vsel %vm422_vm5, %v1298_v49, 0.0 }
 0x738   : > { %1309 = vperm.xlu1 %1858, %v1279_v37  }
 0x73a   : > { %v1316_v57 = vpop.permute.xlu0 %1315 }
 0x73b   : > { %v1318_v59 = vsel %vm443_vm8, %v1316_v57, 0.0 }
 0x73c   : > { %1860 = vset.pattern.permute.xlu1 %v2045_v21 }
 0x73d   : > { %1321 = vperm.xlu1 %1860, %v1279_v37  }
 0x741   : > { %1861 = vset.pattern.permute.xlu1 %v2042_v19 }
 0x742   : > { %1327 = vperm.xlu1 %1861, %v1279_v37  }
 0x7a2   : > { %v1124_v16 = vpop.xlane.xlu1 %1123 }
 0x7a3   : > { %1873 = vrcp.f32 %v1124_v16 }
 0x7a6   : > { %v1333_v47 = vpop.permute.xlu1 %1332 }
 0x7aa   : > { %v1292_v17 = vpop.permute.xlu1 %1291 }
 0x7ab   : > { %v1294_v19 = vsel %vm415_vm3, %v1292_v17, 0.0 }
 0x7ac   : > { %v1295_v50 = vadd.f32 %v1294_v19, %v1288_v48 }
 0x7ae   : > { %v1304_v21 = vpop.permute.xlu1 %1303  ;;  %v1301_v53 = vadd.f32 %v1300_v52, %v1295_v50 }
 0x7b0   : > { %v1874_v20 = vpop.eup %1873 }
 0x7b1   : > { %v1126_v46 = vmul.f32 %v1874_v20, %v1872_v44 }
 0x7b3   : > { %1720 = vmatmul.mubr.msk.f32.vlgmr.msra.gmra.mxu1 %vm332_vm2, %v1126_v46  ;;  %v1310_v51 = vpop.permute.xlu1 %1309 }
 0x7b4   : > { %1728 = vmatpush3.xpose.msk.msra.mxu1 %vm332_vm2, %v1333_v47  ;;  %1729 = vmatprep.mubr.msk.f32.mxu1 %vm2035_vm0, %v2034_v0  ;;  %v1306_v0 = vsel %vm429_vm6, %v1304_v21, 0.0  ;;  %v1312_v54 = vsel %vm436_vm7, %v1310_v51, 0.0 }
 0x7b5   : > { %v1307_v55 = vadd.f32 %v1306_v0, %v1301_v53 }
 0x7b7   : > { %1730 = vmatmul.mubr.msk.f32.vlgmr.msra.gmra.mxu1 %vm332_vm2, %v1210_v31  ;;  %v1313_v58 = vadd.f32 %v1312_v54, %v1307_v55 }
 0x7b8   : > { %v1322_v56 = vpop.permute.xlu1 %1321 }
 0x7b9   : > { %v1319_v7 = vadd.f32 %v1318_v59, %v1313_v58  ;;  %v1324_v61 = vsel %vm450_vm9, %v1322_v56, 0.0 }
 0x7bb   : > { %v1325_v1 = vadd.f32 %v1324_v61, %v1319_v7 }
 0x7bd   : > { %v1328_v60 = vpop.permute.xlu1 %1327 }
 0x7be   : > { %v1330_v62 = vsel %vm457_vm10, %v1328_v60, 0.0 }
 0x7bf   : > { %v1331_v3 = vadd.f32 %v1330_v62, %v1325_v1 }
 0x873   : > { %v1199_v63 = vpop.f32.mrf.mxu1 }
 0x875   : > { %v1721_v2 = vpop.f32.mrf.mxu1 }
 0x877   : > { %v1402_v4 = vpop.f32.mrf.mxu1 }
 0x878   : > { %v1403_v5 = vadd.f32 %v1402_v4, %v1331_v3 }
 0x879   : > { %v1731_v9 = vpop.f32.mrf.mxu1 }
 0x87a   : > { %v1406_v10 = vsel %vm330_vm11, %v1403_v5, -inf }
 0x87b   : > { %v1407_v12 = vsel %vm332_vm2, %v1406_v10, -inf }
 0x87c   : > { %1408 = vmax.xlane.f32.xlu0 %v1407_v12 }
 0x892   : > { %1418 = vrot.lane.b32.xlu0 %v2239_v11, %s2054_s8 }
 0x896   : > { %1204 = vrot.lane.b32.xlu0 %v1199_v63, %s2055_s9 }
 0x905   : > { %v1409_v27 = vpop.xlane.xlu0 %1408 }
 0x906   : > { %v1410_v8 = vsub.f32 %v1406_v10, %v1409_v27 }
 0x908   : > { %v1411_v13 = vmul.f32 1.442695, %v1410_v8 }
 0x909   : > { %v1419_v14 = vpop.permute.xlu0 %1418 }
 0x90a   : > { %1875 = vpow2.f32 %v1411_v13  ;;  %1733 = vmatpush3.msra.mxu0 %v1419_v14 }
 0x90d   : > { %v1205_v22 = vpop.permute.xlu0 %1204 }
 0x917   : > { %v1876_v15 = vpop.eup %1875 }
 0x918   : > { %v1413_v24 = vsel %vm332_vm2, %v1876_v15, 0.0 }
 0x919   : > { %1414 = vadd.xlane.f32.xlu1 %v1413_v24 }
 0x92a   : > { %913 = vrot.lane.b32.xlu1 %v2404_v33, %s2056_s10 }
 0x9a2   : > { %v1415_v25 = vpop.xlane.xlu1 %1414 }
 0x9a3   : > { %1877 = vrcp.f32 %v1415_v25 }
 0x9a6   : > { %v914_v11 = vpop.permute.xlu1 %913 }
 0x9a7   : > { %917 = vst.msk [vmem:[%s2353_s13] sm:$0xff] %vm916_vm12, %v914_v11 }
 0x9a8   : > { %1208 = vst.msk [vmem:[%s2353_s13] sm:$0xff] %vm1207_vm13, %v1205_v22 }
 0x9b0   : > { %v1878_v23 = vpop.eup %1877 }
 0x9b1   : > { %v1417_v26 = vmul.f32 %v1878_v23, %v1876_v15 }
 0x9b3   : > { %1735 = vmatmul.mubr.msk.f32.vlgmr.msra.gmra.mxu0 %vm332_vm2, %v1417_v26 }
 0xa73   : > { %v1490_v28 = vpop.f32.mrf.mxu0 }
 0xa74   : > { %1495 = vrot.lane.b32.xlu1 %v1490_v28, %s2057_s21 }
 0xa75   : > { %v1736_v29 = vpop.f32.mrf.mxu0 }
 0xae6   : > { %v1496_v31 = vpop.permute.xlu1 %1495 }
 0xae7   : > { %1499 = vst.msk [vmem:[%s2353_s13] sm:$0xff] %vm1498_vm14, %v1496_v31 }
 0xae8   : > { %1972 = shalt.err (!%p1969_p9)
}
 0xae9   : > { %s1973_s13 = scalar_lea.hbm %s2457_s7, 128  ;;  %s1977_s28 = scalar_lea.hbm %s2499_s4, 256 }
 0xaea   : > { %p1974_p13 = scmp.ne.s32.totalorder %s2457_s7, %s1973_s13  ;;  %p1978_p4 = scmp.lt.s32.totalorder %s2457_s7, %s2499_s4 }
 0xaeb   : > { %p1979_p8 = scmp.lt.s32.totalorder %s1977_s28, %s1973_s13 }
 0xaec   : > { %p1975_p5 = pnand %p1974_p13, %p2515_p0 }
 0xaed   : > { %p1980_p3 = por %p1979_p8, %p1978_p4 }
 0xaee   : > { %p1976_p10 = pneg %p1975_p5 }
 0xaf0   : > { %p1981_p11 = pnand %p1980_p3, %p1976_p10 }
 0xaf2   : > { %1984 = shalt.err (!%p1981_p11)
}
 0xaf3   : > { %1747 = dma.vmem_to_hbm [thread:$0]  (%p2515_p0), %s1515_s29, 128, %s2457_s7, %s1501_s12  }
 0xaf4 PF: > { %s1526_s10 = sand.u32 1, %s2015_s15   ;;  %p2516_p1 = scmp.ne.s32.totalorder %s2505_s22, 0 }
 0xaf5   : > { %p2517_p2 = scmp.ge.s32.totalorder %s2027_s18, 2  ;;  %s1527_s21 = scalar_lea.sflag [#allocation4], %s1526_s10 }
 0xaf7   : > { %p1761_p6 = pnand %p2517_p2, %p2516_p1 }
 0xaf9   : > { %p1762_p12 = pneg %p1761_p6 }
 0xafb   : > { %2010 = dma.done.wait (%p1762_p12), %s1527_s21, 128  }
 0xafc   : > { %2012 = vsyncadd (%p1762_p12), %s1527_s21, 4294967168  ;;  %p18_p7 = scmp.ge.s32.totalorder %s2156_s11, 4   ;;  %s2518_s15 = smov %s2019_s16 }
 0xafd   : > { %s2519_s16 = smov %s2023_s17  ;;  %s2520_s17 = smov %s2172_s20 }
 0xafe   : > { %s2521_s18 = smov %s2156_s11  ;;  %20 = sbr.rel (!%p18_p7) target bundleno = 6 (0x6), region = 89 }
 0xb03   :  { %1532 = vsyncpa [#allocation3], 1 }
 0xb04   :  { %1534 = vsyncpa [#allocation3 + $0x1], 1 }
 0xb05   :  { %1535 = vsyncpa [#allocation6], 1 }
 0xb06   :  { %1536 = vsyncpa [#allocation4], 1 }
 0xb07   :  { %1538 = vsyncpa [#allocation4 + $0x1], 1 }

</bundles_post_ra>
